<compile_context>
chip_gen: v7x
topology: tpu7x:2x2x1
jax: 0.10.0
libtpu: 0.0.40
codegen_flags: <defaults>
</compile_context>

<pallas_src>
import jax
import jax.numpy as jnp
from jax.experimental import pallas as pl
from jax.experimental.pallas import tpu as pltpu

_EPS = 1e-5


def _mlp_kernel(x_ref,
                w0q_ref, s0_ref, c0_ref,
                w1_ref, c1_ref,
                w2_ref, b2_ref,
                o_ref):
    # ---- FC0 (int8 weight-only) + folded BN0 + ReLU (Dropout = identity) ----
    x = x_ref[...]                                   # bf16 (bm, 2560)
    w0 = w0q_ref[...].astype(jnp.bfloat16)           # int8 -> bf16 upcast (VPU)
    h0 = jnp.dot(x, w0, preferred_element_type=jnp.float32)
    # per-output-channel dequant scale, then folded bias/BN, then ReLU
    h0 = jnp.maximum(h0 * s0_ref[...] + c0_ref[...], 0.0)

    # ---- FC1 (bf16 weights) + folded BN1 + ReLU ----
    h1 = jnp.dot(h0.astype(jnp.bfloat16), w1_ref[...],
                 preferred_element_type=jnp.float32)
    h1 = jnp.maximum(h1 + c1_ref[...], 0.0)

    # ---- FC2 (N=1) as VPU multiply + lane reduction, then Sigmoid ----
    logits = jnp.sum(h1 * w2_ref[...], axis=-1, keepdims=True) + b2_ref[...]

    # Compact (bm, 1) store: ~128x fewer writeback bytes than broadcasting
    # to 128 lanes; the handful of masked stores per tile are free next to
    # the MXU/DMA work.
    o_ref[...] = jax.nn.sigmoid(logits)


def _round_up(n, m):
    return (n + m - 1) // m * m


def _choose_bm(bp, block_b):
    """Batch tile: multiple of 16 (bf16 packing); grid>=2 when batch is big
    enough so the 'parallel' axis can shard across v7x's two TensorCores."""
    if bp <= block_b:
        if bp >= 512:                       # split so each core gets >=256 rows
            return _round_up(pl.cdiv(bp, 2), 16)
        return bp                           # single tile; megacore buys nothing
    return block_b


def dog_vs_cat_forward(x, kernel_params, *, block_b=512):
    """x: [B, 2560] (bf16 preferred) -> [B, 1] float32 sigmoid probabilities."""
    B, D = x.shape
    assert D == 2560
    if x.dtype != jnp.bfloat16:
        # Producers should emit bf16 directly; this cast is only a fallback.
        x = x.astype(jnp.bfloat16)

    w0q, s0, c0, w1, c1, w2, b2 = kernel_params

    # Pad batch only to a multiple of 16 (<= 15 garbage rows, sliced off at
    # the end).  The last grid tile may be partial; Pallas masks its writeback
    # and rows are independent, so stale VMEM in the padded region is benign.
    Bp = _round_up(B, 16)
    if Bp != B:
        x = jnp.pad(x, ((0, Bp - B), (0, 0)))

    bm = _choose_bm(Bp, block_b)
    grid = (pl.cdiv(Bp, bm),)

    const = lambda a: pl.BlockSpec(a.shape, lambda i: (0,) * a.ndim)

    out = pl.pallas_call(
        _mlp_kernel,
        out_shape=jax.ShapeDtypeStruct((Bp, 1), jnp.float32),
        grid=grid,
        in_specs=[pl.BlockSpec((bm, D), lambda i: (i, 0)),
                  const(w0q), const(s0), const(c0),
                  const(w1), const(c1),
                  const(w2), const(b2)],
        out_specs=pl.BlockSpec((bm, 1), lambda i: (i, 0)),
        compiler_params=pltpu.CompilerParams(
            dimension_semantics=("parallel",),
            vmem_limit_bytes=40 << 20),
    )(x, w0q, s0, c0, w1, c1, w2, b2)
    return out[:B]


def init_params(key):
    """PyTorch-equivalent init: Linear U(-1/sqrt(fan_in), ..), BN defaults."""
    ks = jax.random.split(key, 6)

    def linear(kw, kb, fan_in, fan_out):
        bound = 1.0 / jnp.sqrt(fan_in)
        w = jax.random.uniform(kw, (fan_in, fan_out), jnp.float32, -bound, bound)
        b = jax.random.uniform(kb, (fan_out,), jnp.float32, -bound, bound)
        return w, b

    def bn(n):
        return dict(gamma=jnp.ones((n,), jnp.float32),
                    beta=jnp.zeros((n,), jnp.float32),
                    mean=jnp.zeros((n,), jnp.float32),
                    var=jnp.ones((n,), jnp.float32))

    w0, b0 = linear(ks[0], ks[1], 2560, 512)
    w1, b1 = linear(ks[2], ks[3], 512, 128)
    w2, b2 = linear(ks[4], ks[5], 128, 1)
    return dict(w0=w0, b0=b0, bn0=bn(512),
                w1=w1, b1=b1, bn1=bn(128),
                w2=w2, b2=b2)


def fold_params(p):
    """Fold BN (eval stats) + bias into (W', c); int8 w0, bf16 w1."""
    def bn_fold(w, b, bnp):
        scale = bnp["gamma"] / jnp.sqrt(bnp["var"] + _EPS)
        shift = bnp["beta"] - bnp["mean"] * scale
        return w * scale[None, :], b * scale + shift

    w0f, c0 = bn_fold(p["w0"], p["b0"], p["bn0"])      # f32
    w1f, c1 = bn_fold(p["w1"], p["b1"], p["bn1"])      # f32

    # Weight-only int8 quantization of w0, per output channel.
    amax = jnp.max(jnp.abs(w0f), axis=0)               # (512,)
    s0 = jnp.maximum(amax, 1e-12) / 127.0
    w0q = jnp.clip(jnp.round(w0f / s0[None, :]), -127.0, 127.0).astype(jnp.int8)

    return (w0q,
            s0.astype(jnp.float32)[None, :],
            c0.astype(jnp.float32)[None, :],
            w1f.astype(jnp.bfloat16),
            c1.astype(jnp.float32)[None, :],
            p["w2"].reshape(1, 128).astype(jnp.float32),
            p["b2"].reshape(1, 1).astype(jnp.float32))


def reference_forward(x, p):
    """Pure-JAX f32 reference matching the PyTorch module in eval mode."""
    def bn(h, bnp):
        scale = bnp["gamma"] / jnp.sqrt(bnp["var"] + _EPS)
        return (h - bnp["mean"]) * scale + bnp["beta"]

    h = jnp.maximum(bn(x @ p["w0"] + p["b0"], p["bn0"]), 0.0)   # Dropout: identity
    h = jnp.maximum(bn(h @ p["w1"] + p["b1"], p["bn1"]), 0.0)   # Dropout: identity
    return jax.nn.sigmoid(h @ p["w2"] + p["b2"])
    # TODO(synk): eval=True branch (torch.round of the output) is a trivial
    # post-op and is intentionally left outside the kernel.


if __name__ == "__main__":
    key = jax.random.PRNGKey(0)
    kx, kp = jax.random.split(key)

    B = 8  # small batch consistent with the [B, 2560] feature-vector input
    # Producer-side bf16 activations (interface change per perf review).
    x = jax.random.normal(kx, (B, 2560), dtype=jnp.float32).astype(jnp.bfloat16)

    params = init_params(kp)
    kernel_params = fold_params(params)

    out = dog_vs_cat_forward(x, kernel_params)
    out = jax.block_until_ready(out)

    ref = reference_forward(x.astype(jnp.float32), params)
    assert out.shape == (B, 1)
    # int8 w0 (per-channel scales) + bf16 x / w1 vs. the pure-f32 reference:
    # sigmoid-domain error is well under 2e-2 for this init.
    assert jnp.allclose(out, ref, atol=2e-2, rtol=2e-2), (
        f"max abs diff {jnp.max(jnp.abs(out - ref))}")

    print("KERNEL_OK")
</pallas_src>

<mosaic_0001>
module attributes {stable_mosaic.version = 11 : i64} {
  func.func @_mlp_kernel(%arg0: i32, %arg1: memref<16x2560xbf16, #tpu.memory_space<vmem>>, %arg2: memref<2560x512xi8, #tpu.memory_space<vmem>>, %arg3: memref<1x512xf32, #tpu.memory_space<vmem>>, %arg4: memref<1x512xf32, #tpu.memory_space<vmem>>, %arg5: memref<512x128xbf16, #tpu.memory_space<vmem>>, %arg6: memref<1x128xf32, #tpu.memory_space<vmem>>, %arg7: memref<1x128xf32, #tpu.memory_space<vmem>>, %arg8: memref<1x1xf32, #tpu.memory_space<vmem>>, %arg9: memref<16x1xf32, #tpu.memory_space<vmem>>) attributes {dimension_semantics = [#tpu.dimension_semantics<parallel>], iteration_bounds = array<i64: 1>, scalar_prefetch = 0 : i64, scratch_operands = 0 : i64, tpu.core_type = #tpu.core_type<tc>, window_params = [{transform_indices = @transform_0, window_bounds = array<i64: 16, 2560>}, {pipeline_mode = #tpu.pipeline_mode<synchronous>, transform_indices = @transform_1, window_bounds = array<i64: 2560, 512>}, {pipeline_mode = #tpu.pipeline_mode<synchronous>, transform_indices = @transform_2, window_bounds = array<i64: 1, 512>}, {pipeline_mode = #tpu.pipeline_mode<synchronous>, transform_indices = @transform_3, window_bounds = array<i64: 1, 512>}, {pipeline_mode = #tpu.pipeline_mode<synchronous>, transform_indices = @transform_4, window_bounds = array<i64: 512, 128>}, {pipeline_mode = #tpu.pipeline_mode<synchronous>, transform_indices = @transform_5, window_bounds = array<i64: 1, 128>}, {pipeline_mode = #tpu.pipeline_mode<synchronous>, transform_indices = @transform_6, window_bounds = array<i64: 1, 128>}, {pipeline_mode = #tpu.pipeline_mode<synchronous>, transform_indices = @transform_7, window_bounds = array<i64: 1, 1>}, {transform_indices = @transform_8, window_bounds = array<i64: 16, 1>}]} {
    %c0 = arith.constant 0 : index
    %c0_0 = arith.constant 0 : index
    %0 = vector.load %arg1[%c0, %c0_0] : memref<16x2560xbf16, #tpu.memory_space<vmem>>, vector<16x2560xbf16>
    %c0_1 = arith.constant 0 : index
    %c0_2 = arith.constant 0 : index
    %1 = vector.load %arg2[%c0_1, %c0_2] : memref<2560x512xi8, #tpu.memory_space<vmem>>, vector<2560x512xi8>
    %2 = arith.sitofp %1 : vector<2560x512xi8> to vector<2560x512xbf16>
    %cst = arith.constant dense<0.000000e+00> : vector<16x512xf32>
    %3 = tpu.matmul %0, %2, %cst {dimension_numbers = #tpu.dot_dimension_numbers<[1], [0], [0], [1], [0, 0, 1, 1], [], []>} : vector<16x2560xbf16>, vector<2560x512xbf16>, vector<16x512xf32> -> vector<16x512xf32>
    %c0_3 = arith.constant 0 : index
    %c0_4 = arith.constant 0 : index
    %4 = vector.load %arg3[%c0_3, %c0_4] : memref<1x512xf32, #tpu.memory_space<vmem>>, vector<1x512xf32>
    %5 = vector.broadcast %4 : vector<1x512xf32> to vector<16x512xf32>
    %6 = arith.mulf %3, %5 : vector<16x512xf32>
    %c0_5 = arith.constant 0 : index
    %c0_6 = arith.constant 0 : index
    %7 = vector.load %arg4[%c0_5, %c0_6] : memref<1x512xf32, #tpu.memory_space<vmem>>, vector<1x512xf32>
    %8 = vector.broadcast %7 : vector<1x512xf32> to vector<16x512xf32>
    %9 = arith.addf %6, %8 : vector<16x512xf32>
    %cst_7 = arith.constant 0.000000e+00 : f32
    %10 = vector.broadcast %cst_7 : f32 to vector<16x512xf32>
    %11 = arith.maximumf %9, %10 : vector<16x512xf32>
    %12 = arith.truncf %11 : vector<16x512xf32> to vector<16x512xbf16>
    %c0_8 = arith.constant 0 : index
    %c0_9 = arith.constant 0 : index
    %13 = vector.load %arg5[%c0_8, %c0_9] : memref<512x128xbf16, #tpu.memory_space<vmem>>, vector<512x128xbf16>
    %cst_10 = arith.constant dense<0.000000e+00> : vector<16x128xf32>
    %14 = tpu.matmul %12, %13, %cst_10 {dimension_numbers = #tpu.dot_dimension_numbers<[1], [0], [0], [1], [0, 0, 1, 1], [], []>} : vector<16x512xbf16>, vector<512x128xbf16>, vector<16x128xf32> -> vector<16x128xf32>
    %c0_11 = arith.constant 0 : index
    %c0_12 = arith.constant 0 : index
    %15 = vector.load %arg6[%c0_11, %c0_12] : memref<1x128xf32, #tpu.memory_space<vmem>>, vector<1x128xf32>
    %16 = vector.broadcast %15 : vector<1x128xf32> to vector<16x128xf32>
    %17 = arith.addf %14, %16 : vector<16x128xf32>
    %cst_13 = arith.constant 0.000000e+00 : f32
    %18 = vector.broadcast %cst_13 : f32 to vector<16x128xf32>
    %19 = arith.maximumf %17, %18 : vector<16x128xf32>
    %c0_14 = arith.constant 0 : index
    %c0_15 = arith.constant 0 : index
    %20 = vector.load %arg7[%c0_14, %c0_15] : memref<1x128xf32, #tpu.memory_space<vmem>>, vector<1x128xf32>
    %21 = vector.broadcast %20 : vector<1x128xf32> to vector<16x128xf32>
    %22 = arith.mulf %19, %21 : vector<16x128xf32>
    %cst_16 = arith.constant dense<0.000000e+00> : vector<16xf32>
    %23 = vector.multi_reduction <add>, %22, %cst_16 [1] : vector<16x128xf32> to vector<16xf32>
    %24 = vector.shape_cast %23 : vector<16xf32> to vector<16x1xf32>
    %c0_17 = arith.constant 0 : index
    %c0_18 = arith.constant 0 : index
    %25 = vector.load %arg8[%c0_17, %c0_18] : memref<1x1xf32, #tpu.memory_space<vmem>>, vector<1x1xf32>
    %26 = vector.broadcast %25 : vector<1x1xf32> to vector<16x1xf32>
    %27 = arith.addf %24, %26 : vector<16x1xf32>
    %28 = arith.negf %27 : vector<16x1xf32>
    %29 = math.exp %28 : vector<16x1xf32>
    %cst_19 = arith.constant 1.000000e+00 : f32
    %30 = vector.broadcast %cst_19 : f32 to vector<16x1xf32>
    %31 = arith.addf %30, %29 : vector<16x1xf32>
    %32 = arith.divf %30, %31 : vector<16x1xf32>
    %c0_20 = arith.constant 0 : index
    %c0_21 = arith.constant 0 : index
    %33 = vector.load %arg9[%c0_20, %c0_21] : memref<16x1xf32, #tpu.memory_space<vmem>>, vector<16x1xf32>
    tpu.vector_store %arg9[%c0_20, %c0_21], %32 {strides = array<i32>} : memref<16x1xf32, #tpu.memory_space<vmem>>, vector<16x1xf32>,
    return
  }
  func.func @transform_0(%arg0: i32) -> (i32, i32) {
    %c0_i32 = arith.constant 0 : i32
    %c0_i32_0 = arith.constant 0 : i32
    return %arg0, %c0_i32 : i32, i32
  }
  func.func @transform_1(%arg0: i32) -> (i32, i32) {
    %c0_i32 = arith.constant 0 : i32
    %c0_i32_0 = arith.constant 0 : i32
    %c0_i32_1 = arith.constant 0 : i32
    return %c0_i32, %c0_i32_0 : i32, i32
  }
  func.func @transform_2(%arg0: i32) -> (i32, i32) {
    %c0_i32 = arith.constant 0 : i32
    %c0_i32_0 = arith.constant 0 : i32
    %c0_i32_1 = arith.constant 0 : i32
    return %c0_i32, %c0_i32_0 : i32, i32
  }
  func.func @transform_3(%arg0: i32) -> (i32, i32) {
    %c0_i32 = arith.constant 0 : i32
    %c0_i32_0 = arith.constant 0 : i32
    %c0_i32_1 = arith.constant 0 : i32
    return %c0_i32, %c0_i32_0 : i32, i32
  }
  func.func @transform_4(%arg0: i32) -> (i32, i32) {
    %c0_i32 = arith.constant 0 : i32
    %c0_i32_0 = arith.constant 0 : i32
    %c0_i32_1 = arith.constant 0 : i32
    return %c0_i32, %c0_i32_0 : i32, i32
  }
  func.func @transform_5(%arg0: i32) -> (i32, i32) {
    %c0_i32 = arith.constant 0 : i32
    %c0_i32_0 = arith.constant 0 : i32
    %c0_i32_1 = arith.constant 0 : i32
    return %c0_i32, %c0_i32_0 : i32, i32
  }
  func.func @transform_6(%arg0: i32) -> (i32, i32) {
    %c0_i32 = arith.constant 0 : i32
    %c0_i32_0 = arith.constant 0 : i32
    %c0_i32_1 = arith.constant 0 : i32
    return %c0_i32, %c0_i32_0 : i32, i32
  }
  func.func @transform_7(%arg0: i32) -> (i32, i32) {
    %c0_i32 = arith.constant 0 : i32
    %c0_i32_0 = arith.constant 0 : i32
    %c0_i32_1 = arith.constant 0 : i32
    return %c0_i32, %c0_i32_0 : i32, i32
  }
  func.func @transform_8(%arg0: i32) -> (i32, i32) {
    %c0_i32 = arith.constant 0 : i32
    %c0_i32_0 = arith.constant 0 : i32
    return %arg0, %c0_i32 : i32, i32
  }
}

</mosaic_0001>

<bundles_post_ra>
// kernel: tpu_custom_call.1
= control target key start
LH: loop header
LB: loop body
LE: loop exit
PB: predicated region body
PF: predicated region fallthrough
CT: control target
= control target key end

     0   :  { %s3099_s0 = inlined_call_operand.hbm [shape: bf16[16,2560], index: 0, kind: input, shape index: {}]   ;;  %s3100_s1 = inlined_call_operand.hbm [shape: s8[2560,512], index: 1, kind: input, shape index: {}]   ;;  %s3101_s2 = inlined_call_operand.hbm [shape: f32[1,512], index: 2, kind: input, shape index: {}]   ;;  %s3102_s3 = inlined_call_operand.hbm [shape: f32[1,512], index: 3, kind: input, shape index: {}]   ;;  %s3103_s4 = inlined_call_operand.hbm [shape: bf16[512,128], index: 4, kind: input, shape index: {}]   ;;  %s3104_s5 = inlined_call_operand.hbm [shape: f32[1,128], index: 5, kind: input, shape index: {}]   ;;  %s3105_s6 = inlined_call_operand.hbm [shape: f32[1,128], index: 6, kind: input, shape index: {}]   ;;  %s3106_s7 = inlined_call_operand.<no memory space> [shape: f32[1,1], index: 7, kind: input, shape index: {}]   ;;  %s3107_s8 = inlined_call_operand.vmem [shape: f32[16,1], index: 8, kind: output, shape index: {}]  }
   0x1   :  { %v13_v0 = vstv %s3106_s7 }
   0x2   :  { %14 = vst [vmem:[#allocation2] sm:$0x1] %v13_v0 }
   0x3   :  { %15 = vsyncpa [#allocation4], 0 }
   0x4   :  { %16 = vsyncpa [#allocation6], 0 }
   0x5   :  { %17 = vsyncpa [#allocation9], 0 }
   0x6   :  { %18 = vsyncpa [#allocation12], 0  ;;  %s2941_s29 = smov [#allocation5]   ;;  %s2779_s11 = scalar_lea.hbm %s3100_s1, 40960 }
   0x7   :  { %s36_s30 = sshll.u32 %s2941_s29, 4  ;;  %p2780_p0 = scmp.ne.s32.totalorder %s3100_s1, %s2779_s11  ;;  %s37_s30 = int_to_ptr.vmem [resolvable:$true] %s36_s30 }
   0x8   :  { %p2783_p1 = scmp.lt.u32.totalorder %s2779_s11, %s3100_s1 }
   0xa   :  { %p2785_p2 = pnand %p2783_p1, %p2780_p0 }
   0xc   :  { %2788 = shalt.err (!%p2785_p2)
}
   0xd   :  { %s2789_s7 = scalar_lea.vmem %s37_s30, 40960  ;;  %p2794_p4 = scmp.lt.s32.totalorder %s37_s30, %s37_s30 }
   0xe   :  { %p2790_p3 = scmp.ne.s32.totalorder %s37_s30, %s2789_s7  ;;  %p2795_p5 = scmp.lt.s32.totalorder %s2789_s7, %s2789_s7 }
  0x10   :  { %p2796_p6 = por %p2795_p5, %p2794_p4 }
  0x12   :  { %p2797_p7 = pnand %p2796_p6, %p2790_p3 }
  0x14   :  { %2800 = shalt.err (!%p2797_p7)
}
  0x15   :  { %s2942_s16 = smov 512   ;;  %s2943_s17 = smov 32  }
  0x16   :  { %42 = dma.hbm_to_vmem [thread:$0]  %s3100_s1, 40960, %s37_s30, [#allocation6], %s2942_s16, %s2942_s16, %s2943_s17  }
  0x17   :  { %s2944_s20 = smov [#allocation8]   ;;  %s2945_s22 = smov [#allocation11]  }
  0x18   :  { %s59_s21 = sshll.u32 %s2944_s20, 4  ;;  %s81_s23 = sshll.u32 %s2945_s22, 4  ;;  %s60_s21 = int_to_ptr.vmem [resolvable:$true] %s59_s21  ;;  %s82_s23 = int_to_ptr.vmem [resolvable:$true] %s81_s23 }
  0x19   :  { %s2801_s26 = scalar_lea.hbm %s3102_s3, 64 }
  0x1a   :  { %p2802_p8 = scmp.ne.s32.totalorder %s3102_s3, %s2801_s26  ;;  %p2805_p9 = scmp.lt.u32.totalorder %s2801_s26, %s3102_s3 }
  0x1c   :  { %p2807_p10 = pnand %p2805_p9, %p2802_p8 }
  0x1e   :  { %2810 = shalt.err (!%p2807_p10)
}
  0x1f   :  { %s2811_s1 = scalar_lea.vmem %s60_s21, 64  ;;  %p2816_p12 = scmp.lt.s32.totalorder %s60_s21, %s60_s21 }
  0x20   :  { %p2812_p11 = scmp.ne.s32.totalorder %s60_s21, %s2811_s1  ;;  %p2817_p13 = scmp.lt.s32.totalorder %s2811_s1, %s2811_s1 }
  0x22   :  { %p2818_p0 = por %p2817_p13, %p2816_p12 }
  0x24   :  { %p2819_p1 = pnand %p2818_p0, %p2812_p11 }
  0x26   :  { %2822 = shalt.err (!%p2819_p1)
}
  0x27   :  { %62 = dma.hbm_to_vmem [thread:$0]  %s3102_s3, 64, %s60_s21, [#allocation9]  }
  0x28   :  { %s2823_s13 = scalar_lea.hbm %s3104_s5, 16 }
  0x29   :  { %p2824_p2 = scmp.ne.s32.totalorder %s3104_s5, %s2823_s13  ;;  %p2827_p3 = scmp.lt.u32.totalorder %s2823_s13, %s3104_s5 }
  0x2b   :  { %p2829_p4 = pnand %p2827_p3, %p2824_p2 }
  0x2d   :  { %2832 = shalt.err (!%p2829_p4)
}
  0x2e   :  { %s2833_s17 = scalar_lea.vmem %s82_s23, 16  ;;  %s2837_s18 = scalar_lea.vmem %s82_s23, 32 }
  0x2f   :  { %p2834_p5 = scmp.ne.s32.totalorder %s82_s23, %s2833_s17  ;;  %p2838_p6 = scmp.lt.s32.totalorder %s82_s23, %s82_s23 }
  0x30   :  { %p2839_p7 = scmp.lt.s32.totalorder %s2837_s18, %s2833_s17 }
  0x32   :  { %p2840_p8 = por %p2839_p7, %p2838_p6 }
  0x34   :  { %p2841_p9 = pnand %p2840_p8, %p2834_p5 }
  0x36   :  { %2844 = shalt.err (!%p2841_p9)
}
  0x37   :  { %84 = dma.hbm_to_vmem [thread:$0]  %s3104_s5, 16, %s82_s23, [#allocation12]  }
  0x38   :  { %s2946_s20 = smov [#allocation3]   ;;  %s2845_s25 = scalar_lea.hbm %s3099_s0, 2560 }
  0x39   :  { %s24_s21 = sshll.u32 %s2946_s20, 4  ;;  %p2846_p10 = scmp.ne.s32.totalorder %s3099_s0, %s2845_s25  ;;  %s25_s21 = int_to_ptr.vmem [resolvable:$true] %s24_s21 }
  0x3a   :  { %p2849_p11 = scmp.lt.u32.totalorder %s2845_s25, %s3099_s0 }
  0x3c   :  { %p2851_p12 = pnand %p2849_p11, %p2846_p10 }
  0x3e   :  { %2854 = shalt.err (!%p2851_p12)
}
  0x3f   :  { %s2855_s9 = scalar_lea.vmem %s25_s21, 2560  ;;  %p2860_p0 = scmp.lt.s32.totalorder %s25_s21, %s25_s21 }
  0x40   :  { %p2856_p13 = scmp.ne.s32.totalorder %s25_s21, %s2855_s9  ;;  %p2861_p1 = scmp.lt.s32.totalorder %s2855_s9, %s2855_s9 }
  0x42   :  { %p2862_p2 = por %p2861_p1, %p2860_p0 }
  0x44   :  { %p2863_p3 = pnand %p2862_p2, %p2856_p13 }
  0x46   :  { %2866 = shalt.err (!%p2863_p3)
}
  0x47   :  { %s2947_s5 = smov 1280   ;;  %s2948_s23 = smov 80  }
  0x48   :  { %30 = dma.hbm_to_vmem [thread:$0]  %s3099_s0, 2560, %s25_s21, [#allocation4], %s2947_s5, %s2947_s5, %s2948_s23  }
  0x49   :  { %s2949_s10 = smov [#allocation7]   ;;  %s2950_s12 = smov [#allocation10]  }
  0x4a   :  { %s49_s11 = sshll.u32 %s2949_s10, 4  ;;  %s68_s13 = sshll.u32 %s2950_s12, 4  ;;  %s50_s11 = int_to_ptr.vmem [resolvable:$true] %s49_s11  ;;  %s3050_s13 = int_to_ptr.vmem [resolvable:$true] %s68_s13 }
  0x4b   :  { %s2867_s7 = scalar_lea.hbm %s3101_s2, 64 }
  0x4c   :  { %p2868_p4 = scmp.ne.s32.totalorder %s3101_s2, %s2867_s7  ;;  %p2871_p5 = scmp.lt.u32.totalorder %s2867_s7, %s3101_s2 }
  0x4e   :  { %p2873_p6 = pnand %p2871_p5, %p2868_p4 }
  0x50   :  { %2876 = shalt.err (!%p2873_p6)
}
  0x51   :  { %s2877_s0 = scalar_lea.vmem %s50_s11, 64  ;;  %p2882_p8 = scmp.lt.s32.totalorder %s50_s11, %s50_s11 }
  0x52   :  { %p2878_p7 = scmp.ne.s32.totalorder %s50_s11, %s2877_s0  ;;  %p2883_p9 = scmp.lt.s32.totalorder %s2877_s0, %s2877_s0 }
  0x54   :  { %p2884_p10 = por %p2883_p9, %p2882_p8 }
  0x56   :  { %p2885_p11 = pnand %p2884_p10, %p2878_p7 }
  0x58   :  { %2888 = shalt.err (!%p2885_p11)
}
  0x59   :  { %52 = dma.hbm_to_vmem [thread:$0]  %s3101_s2, 64, %s50_s11, [#allocation6]  }
  0x5a   :  { %s2889_s24 = scalar_lea.hbm %s3103_s4, 4096 }
  0x5b   :  { %p2890_p12 = scmp.ne.s32.totalorder %s3103_s4, %s2889_s24  ;;  %p2893_p13 = scmp.lt.u32.totalorder %s2889_s24, %s3103_s4 }
  0x5d   :  { %p2895_p0 = pnand %p2893_p13, %p2890_p12 }
  0x5f   :  { %2898 = shalt.err (!%p2895_p0)
}
  0x60   :  { %s2899_s29 = scalar_lea.vmem %s3050_s13, 4096  ;;  %p2904_p2 = scmp.lt.s32.totalorder %s3050_s13, %s3050_s13 }
  0x61   :  { %p2900_p1 = scmp.ne.s32.totalorder %s3050_s13, %s2899_s29  ;;  %p2905_p3 = scmp.lt.s32.totalorder %s2899_s29, %s2899_s29 }
  0x63   :  { %p2906_p4 = por %p2905_p3, %p2904_p2 }
  0x65   :  { %p2907_p5 = pnand %p2906_p4, %p2900_p1 }
  0x67   :  { %2910 = shalt.err (!%p2907_p5)
}
  0x68   :  { %s2951_s2 = smov 64   ;;  %s2952_s9 = smov 4  }
  0x69   :  { %74 = dma.hbm_to_vmem [thread:$0]  %s3103_s4, 4096, %s3050_s13, [#allocation9], %s2951_s2, %s2951_s2, %s2952_s9  }
  0x6a   :  { %s2953_s1 = smov [#allocation13]   ;;  %s2911_s12 = scalar_lea.hbm %s3105_s6, 16 }
  0x6b   :  { %s91_s30 = sshll.u32 %s2953_s1, 4  ;;  %p2912_p6 = scmp.ne.s32.totalorder %s3105_s6, %s2911_s12  ;;  %s92_s30 = int_to_ptr.vmem [resolvable:$true] %s91_s30 }
  0x6c   :  { %p2915_p7 = scmp.lt.u32.totalorder %s2911_s12, %s3105_s6 }
  0x6e   :  { %p2917_p8 = pnand %p2915_p7, %p2912_p6 }
  0x70   :  { %2920 = shalt.err (!%p2917_p8)
}
  0x71   :  { %s2921_s17 = scalar_lea.vmem %s92_s30, 16  ;;  %s2925_s4 = scalar_lea.vmem %s92_s30, 32 }
  0x72   :  { %p2922_p9 = scmp.ne.s32.totalorder %s92_s30, %s2921_s17  ;;  %p2926_p10 = scmp.lt.s32.totalorder %s92_s30, %s92_s30 }
  0x73   :  { %p2927_p11 = scmp.lt.s32.totalorder %s2925_s4, %s2921_s17 }
  0x75   :  { %p2928_p12 = por %p2927_p11, %p2926_p10 }
  0x77   :  { %p2929_p13 = pnand %p2928_p12, %p2922_p9 }
  0x79   :  { %2932 = shalt.err (!%p2929_p13)
}
  0x7a   :  { %94 = dma.hbm_to_vmem [thread:$0]  %s3105_s6, 16, %s92_s30, [#allocation12]  }
  0x7b   :  { %2933 = dma.done.wait [#allocation4], 2560  }
  0x7c   :  { %2934 = vsyncadd [#allocation4], 4294964736 }
  0x7d   :  { %2935 = dma.done.wait [#allocation6], 41024  }
  0x7e   :  { %2936 = vsyncadd [#allocation6], 4294926272 }
  0x7f   :  { %2937 = dma.done.wait [#allocation9], 4160  }
  0x80   :  { %2938 = vsyncadd [#allocation9], 4294963136 }
  0x81   :  { %2939 = dma.done.wait [#allocation12], 32  }
  0x82   :  { %2940 = vsyncadd [#allocation12], 4294967264  ;;  %v140_v1 = vld [vmem:[#allocation5 + $0x8] sm:$0xff]  ;;  %v142_v2 = vld [vmem:[#allocation5 + $0x18] sm:$0xff]  ;;  %vm2512_vm0 = vcmask 7168  }
  0x83   :  { %v139_v3 = vld [vmem:[#allocation5] sm:$0xff]  ;;  %v460_v4 = vunpack.c.l.s8.bf16 %v140_v1  ;;  %v464_v5 = vunpack.c.h.s8.bf16 %v140_v1  ;;  %v462_v6 = vunpack.c.l.s8.bf16 %v142_v2  ;;  %v466_v7 = vunpack.c.h.s8.bf16 %v142_v2  ;;  %v141_v8 = vld [vmem:[#allocation5 + $0x10] sm:$0xff]  ;;  %v144_v11 = vld [vmem:[#allocation5 + $0x28] sm:$0xff] }
  0x84   :  { %v459_v9 = vunpack.c.l.s8.bf16 %v139_v3  ;;  %v461_v10 = vunpack.c.l.s8.bf16 %v141_v8  ;;  %v146_v12 = vld [vmem:[#allocation5 + $0x38] sm:$0xff]  ;;  %v463_v13 = vunpack.c.h.s8.bf16 %v139_v3  ;;  %v465_v14 = vunpack.c.h.s8.bf16 %v141_v8  ;;  %v143_v17 = vld [vmem:[#allocation5 + $0x20] sm:$0xff]  ;;  %v145_v18 = vld [vmem:[#allocation5 + $0x30] sm:$0xff] }
  0x85   :  { %1199 = vmatprep.subr.bf16.mxu0 %v460_v4  ;;  %1629 = vmatprep.subr.bf16.mxu1 %v462_v6  ;;  %v468_v15 = vunpack.c.l.s8.bf16 %v144_v11  ;;  %v470_v16 = vunpack.c.l.s8.bf16 %v146_v12  ;;  %v467_v19 = vunpack.c.l.s8.bf16 %v143_v17  ;;  %v469_v20 = vunpack.c.l.s8.bf16 %v145_v18  ;;  %v148_v23 = vld [vmem:[#allocation5 + $0x48] sm:$0xff]  ;;  %v150_v24 = vld [vmem:[#allocation5 + $0x58] sm:$0xff]  ;;  %v2711_v25 = vld [vmem:[#allocation3 + $0x4] ss:$80 sps:$4 sm:$0xff]  }
  0x86   :  { %1200 = vmatpush1.bf16.msra.mxu0 %v459_v9  ;;  %1630 = vmatpush1.bf16.msra.mxu1 %v461_v10  ;;  %v472_v21 = vunpack.c.h.s8.bf16 %v144_v11  ;;  %v474_v22 = vunpack.c.h.s8.bf16 %v146_v12  ;;  %v471_v26 = vunpack.c.h.s8.bf16 %v143_v17  ;;  %v473_v27 = vunpack.c.h.s8.bf16 %v145_v18  ;;  %v147_v30 = vld [vmem:[#allocation5 + $0x40] sm:$0xff]  ;;  %v149_v31 = vld [vmem:[#allocation5 + $0x50] sm:$0xff]  ;;  %v152_v36 = vld [vmem:[#allocation5 + $0x68] sm:$0xff] }
  0x87   :  { %1201 = vmatprep.subr.bf16.mxu0 %v464_v5  ;;  %1631 = vmatprep.subr.bf16.mxu1 %v466_v7  ;;  %v476_v28 = vunpack.c.l.s8.bf16 %v148_v23  ;;  %v478_v29 = vunpack.c.l.s8.bf16 %v150_v24  ;;  %v475_v32 = vunpack.c.l.s8.bf16 %v147_v30  ;;  %v477_v33 = vunpack.c.l.s8.bf16 %v149_v31  ;;  %v154_v37 = vld [vmem:[#allocation5 + $0x78] sm:$0xff]  ;;  %v151_v42 = vld [vmem:[#allocation5 + $0x60] sm:$0xff]  ;;  %v153_v43 = vld [vmem:[#allocation5 + $0x70] sm:$0xff] }
  0x88   :  { %1231 = vmatprep.mubr.bf16.mxu0 %v2711_v25  ;;  %1661 = vmatprep.mubr.bf16.mxu1 %v2711_v25  ;;  %v480_v34 = vunpack.c.h.s8.bf16 %v148_v23  ;;  %v482_v35 = vunpack.c.h.s8.bf16 %v150_v24  ;;  %v479_v38 = vunpack.c.h.s8.bf16 %v147_v30  ;;  %v481_v39 = vunpack.c.h.s8.bf16 %v149_v31  ;;  %v156_v48 = vld [vmem:[#allocation5 + $0x88] sm:$0xff]  ;;  %v158_v49 = vld [vmem:[#allocation5 + $0x98] sm:$0xff]  ;;  %v155_v52 = vld [vmem:[#allocation5 + $0x80] sm:$0xff] }
  0x89   :  { %v484_v40 = vunpack.c.l.s8.bf16 %v152_v36  ;;  %v486_v41 = vunpack.c.l.s8.bf16 %v154_v37  ;;  %v483_v44 = vunpack.c.l.s8.bf16 %v151_v42  ;;  %v485_v45 = vunpack.c.l.s8.bf16 %v153_v43  ;;  %v157_v55 = vld [vmem:[#allocation5 + $0x90] sm:$0xff]  ;;  %v160_v60 = vld [vmem:[#allocation5 + $0xa8] sm:$0xff]  ;;  %v162_v61 = vld [vmem:[#allocation5 + $0xb8] sm:$0xff] }
  0x8a   :  { %1202 = vmatpush1.bf16.msra.mxu0 %v463_v13  ;;  %1632 = vmatpush1.bf16.msra.mxu1 %v465_v14  ;;  %v488_v46 = vunpack.c.h.s8.bf16 %v152_v36  ;;  %v490_v47 = vunpack.c.h.s8.bf16 %v154_v37  ;;  %v487_v50 = vunpack.c.h.s8.bf16 %v151_v42  ;;  %v489_v51 = vunpack.c.h.s8.bf16 %v153_v43  ;;  %v159_v62 = vld [vmem:[#allocation5 + $0xa0] sm:$0xff]  ;;  %v161_v63 = vld [vmem:[#allocation5 + $0xb0] sm:$0xff]  ;;  %v164_v8 = vld [vmem:[#allocation5 + $0xc8] sm:$0xff] }
  0x8b   :  { %1203 = vmatprep.subr.bf16.mxu0 %v468_v15  ;;  %1633 = vmatprep.subr.bf16.mxu1 %v470_v16  ;;  %v492_v53 = vunpack.c.l.s8.bf16 %v156_v48  ;;  %v494_v54 = vunpack.c.l.s8.bf16 %v158_v49  ;;  %v491_v56 = vunpack.c.l.s8.bf16 %v155_v52  ;;  %v493_v57 = vunpack.c.l.s8.bf16 %v157_v55  ;;  %v166_v9 = vld [vmem:[#allocation5 + $0xd8] sm:$0xff]  ;;  %v163_v10 = vld [vmem:[#allocation5 + $0xc0] sm:$0xff]  ;;  %v165_v11 = vld [vmem:[#allocation5 + $0xd0] sm:$0xff] }
  0x8c   :  { %v496_v58 = vunpack.c.h.s8.bf16 %v156_v48  ;;  %v498_v59 = vunpack.c.h.s8.bf16 %v158_v49  ;;  %v495_v0 = vunpack.c.h.s8.bf16 %v155_v52  ;;  %v497_v1 = vunpack.c.h.s8.bf16 %v157_v55  ;;  %v169_v23 = vld [vmem:[#allocation5 + $0xf0] sm:$0xff]  ;;  %v175_v52 = vld [vmem:[#allocation5 + $0x120] sm:$0xff] }
  0x8d   :  { %v500_v2 = vunpack.c.l.s8.bf16 %v160_v60  ;;  %v502_v3 = vunpack.c.l.s8.bf16 %v162_v61  ;;  %v499_v4 = vunpack.c.l.s8.bf16 %v159_v62  ;;  %v501_v5 = vunpack.c.l.s8.bf16 %v161_v63 }
  0x8e   :  { %1204 = vmatpush1.bf16.msra.mxu0 %v467_v19  ;;  %1634 = vmatpush1.bf16.msra.mxu1 %v469_v20  ;;  %v504_v6 = vunpack.c.h.s8.bf16 %v160_v60  ;;  %v506_v7 = vunpack.c.h.s8.bf16 %v162_v61  ;;  %v503_v12 = vunpack.c.h.s8.bf16 %v159_v62  ;;  %v505_v13 = vunpack.c.h.s8.bf16 %v161_v63  ;;  %v168_v20 = vld [vmem:[#allocation5 + $0xe8] sm:$0xff] }
  0x8f   :  { %1205 = vmatprep.subr.bf16.mxu0 %v472_v21  ;;  %1635 = vmatprep.subr.bf16.mxu1 %v474_v22  ;;  %v508_v14 = vunpack.c.l.s8.bf16 %v164_v8  ;;  %v510_v15 = vunpack.c.l.s8.bf16 %v166_v9  ;;  %v507_v16 = vunpack.c.l.s8.bf16 %v163_v10  ;;  %v509_v17 = vunpack.c.l.s8.bf16 %v165_v11  ;;  %v170_v21 = vld [vmem:[#allocation5 + $0xf8] sm:$0xff]  ;;  %v167_v22 = vld [vmem:[#allocation5 + $0xe0] sm:$0xff] }
  0x90   :  { %v512_v18 = vunpack.c.h.s8.bf16 %v164_v8  ;;  %v514_v19 = vunpack.c.h.s8.bf16 %v166_v9  ;;  %v511_v24 = vunpack.c.h.s8.bf16 %v163_v10  ;;  %v513_v25 = vunpack.c.h.s8.bf16 %v165_v11 }
  0x91   :  { %v520_v30 = vunpack.c.h.s8.bf16 %v168_v20  ;;  %v522_v31 = vunpack.c.h.s8.bf16 %v170_v21  ;;  %v535_v60 = vunpack.c.h.s8.bf16 %v175_v52 }
  0x92   :  { %1206 = vmatpush1.bf16.msra.mxu0 %v471_v26  ;;  %1636 = vmatpush1.bf16.msra.mxu1 %v473_v27  ;;  %v516_v26 = vunpack.c.l.s8.bf16 %v168_v20  ;;  %v518_v27 = vunpack.c.l.s8.bf16 %v170_v21 }
  0x93   :  { %1207 = vmatprep.subr.bf16.mxu0 %v476_v28  ;;  %1637 = vmatprep.subr.bf16.mxu1 %v478_v29  ;;  %v515_v28 = vunpack.c.l.s8.bf16 %v167_v22  ;;  %v517_v29 = vunpack.c.l.s8.bf16 %v169_v23 }
  0x96   :  { %1208 = vmatpush1.bf16.msra.mxu0 %v475_v32  ;;  %1638 = vmatpush1.bf16.msra.mxu1 %v477_v33  ;;  %v172_v32 = vld [vmem:[#allocation5 + $0x108] sm:$0xff]  ;;  %v174_v33 = vld [vmem:[#allocation5 + $0x118] sm:$0xff] }
  0x97   :  { %1209 = vmatprep.subr.bf16.mxu0 %v480_v34  ;;  %1639 = vmatprep.subr.bf16.mxu1 %v482_v35  ;;  %v519_v34 = vunpack.c.h.s8.bf16 %v167_v22  ;;  %v521_v35 = vunpack.c.h.s8.bf16 %v169_v23  ;;  %v524_v36 = vunpack.c.l.s8.bf16 %v172_v32  ;;  %v526_v37 = vunpack.c.l.s8.bf16 %v174_v33 }
  0x98   :  { %v528_v43 = vunpack.c.h.s8.bf16 %v172_v32 }
  0x9a   :  { %1210 = vmatpush1.bf16.msra.mxu0 %v479_v38  ;;  %1640 = vmatpush1.bf16.msra.mxu1 %v481_v39  ;;  %v171_v38 = vld [vmem:[#allocation5 + $0x100] sm:$0xff]  ;;  %v173_v39 = vld [vmem:[#allocation5 + $0x110] sm:$0xff] }
  0x9b   :  { %1211 = vmatprep.subr.bf16.mxu0 %v484_v40  ;;  %1641 = vmatprep.subr.bf16.mxu1 %v486_v41  ;;  %v2709_v40 = vld [vmem:[#allocation3] ss:$80 sps:$4 sm:$0xff]   ;;  %v523_v41 = vunpack.c.l.s8.bf16 %v171_v38  ;;  %v525_v42 = vunpack.c.l.s8.bf16 %v173_v39  ;;  %v527_v48 = vunpack.c.h.s8.bf16 %v171_v38  ;;  %v529_v49 = vunpack.c.h.s8.bf16 %v173_v39 }
  0x9e   :  { %1212 = vmatpush1.bf16.msra.mxu0 %v483_v44  ;;  %1642 = vmatpush1.bf16.msra.mxu1 %v485_v45  ;;  %v530_v44 = vunpack.c.h.s8.bf16 %v174_v33  ;;  %v176_v45 = vld [vmem:[#allocation5 + $0x128] sm:$0xff] }
  0x9f   :  { %1213 = vmatprep.subr.bf16.mxu0 %v488_v46  ;;  %1643 = vmatprep.subr.bf16.mxu1 %v490_v47  ;;  %v178_v46 = vld [vmem:[#allocation5 + $0x138] sm:$0xff] }
  0xa0   :  { %v2714_v47 = vld [vmem:[#allocation3 + $0xc] ss:$80 sps:$4 sm:$0xff]  }
  0xa2   :  { %1214 = vmatpush1.bf16.msra.mxu0 %v487_v50  ;;  %1644 = vmatpush1.bf16.msra.mxu1 %v489_v51  ;;  %v532_v50 = vunpack.c.l.s8.bf16 %v176_v45  ;;  %v534_v51 = vunpack.c.l.s8.bf16 %v178_v46 }
  0xa3   :  { %1215 = vmatprep.subr.bf16.mxu0 %v492_v53  ;;  %1645 = vmatprep.subr.bf16.mxu1 %v494_v54  ;;  %v177_v53 = vld [vmem:[#allocation5 + $0x130] sm:$0xff]  ;;  %v531_v54 = vunpack.c.l.s8.bf16 %v175_v52 }
  0xa4   :  { %v533_v55 = vunpack.c.l.s8.bf16 %v177_v53  ;;  %v537_v61 = vunpack.c.h.s8.bf16 %v177_v53 }
  0xa6   :  { %1216 = vmatpush1.bf16.msra.mxu0 %v491_v56  ;;  %1646 = vmatpush1.bf16.msra.mxu1 %v493_v57  ;;  %v536_v56 = vunpack.c.h.s8.bf16 %v176_v45  ;;  %v538_v57 = vunpack.c.h.s8.bf16 %v178_v46 }
  0xa7   :  { %1217 = vmatprep.subr.bf16.mxu0 %v496_v58  ;;  %1647 = vmatprep.subr.bf16.mxu1 %v498_v59  ;;  %v180_v58 = vld [vmem:[#allocation5 + $0x148] sm:$0xff]  ;;  %v182_v59 = vld [vmem:[#allocation5 + $0x158] sm:$0xff] }
  0xa8   :  { %v540_v62 = vunpack.c.l.s8.bf16 %v180_v58  ;;  %v542_v63 = vunpack.c.l.s8.bf16 %v182_v59 }
  0xaa   :  { %1218 = vmatpush1.bf16.msra.mxu0 %v495_v0  ;;  %1648 = vmatpush1.bf16.msra.mxu1 %v497_v1  ;;  %v179_v0 = vld [vmem:[#allocation5 + $0x140] sm:$0xff]  ;;  %v181_v1 = vld [vmem:[#allocation5 + $0x150] sm:$0xff] }
  0xab   :  { %1219 = vmatprep.subr.bf16.mxu0 %v500_v2  ;;  %1649 = vmatprep.subr.bf16.mxu1 %v502_v3  ;;  %v539_v2 = vunpack.c.l.s8.bf16 %v179_v0  ;;  %v541_v3 = vunpack.c.l.s8.bf16 %v181_v1  ;;  %v543_v8 = vunpack.c.h.s8.bf16 %v179_v0  ;;  %v545_v9 = vunpack.c.h.s8.bf16 %v181_v1 }
  0xae   :  { %1220 = vmatpush1.bf16.msra.mxu0 %v499_v4  ;;  %1650 = vmatpush1.bf16.msra.mxu1 %v501_v5  ;;  %v544_v4 = vunpack.c.h.s8.bf16 %v180_v58  ;;  %v546_v5 = vunpack.c.h.s8.bf16 %v182_v59 }
  0xaf   :  { %1221 = vmatprep.subr.bf16.mxu0 %v504_v6  ;;  %1651 = vmatprep.subr.bf16.mxu1 %v506_v7  ;;  %v184_v6 = vld [vmem:[#allocation5 + $0x168] sm:$0xff]  ;;  %v186_v7 = vld [vmem:[#allocation5 + $0x178] sm:$0xff] }
  0xb0   :  { %v548_v10 = vunpack.c.l.s8.bf16 %v184_v6  ;;  %v550_v11 = vunpack.c.l.s8.bf16 %v186_v7 }
  0xb2   :  { %1222 = vmatpush1.bf16.msra.mxu0 %v503_v12  ;;  %1652 = vmatpush1.bf16.msra.mxu1 %v505_v13  ;;  %v183_v12 = vld [vmem:[#allocation5 + $0x160] sm:$0xff]  ;;  %v185_v13 = vld [vmem:[#allocation5 + $0x170] sm:$0xff] }
  0xb3   :  { %1223 = vmatprep.subr.bf16.mxu0 %v508_v14  ;;  %1653 = vmatprep.subr.bf16.mxu1 %v510_v15  ;;  %v547_v14 = vunpack.c.l.s8.bf16 %v183_v12  ;;  %v549_v15 = vunpack.c.l.s8.bf16 %v185_v13  ;;  %v551_v20 = vunpack.c.h.s8.bf16 %v183_v12  ;;  %v553_v21 = vunpack.c.h.s8.bf16 %v185_v13 }
  0xb6   :  { %1224 = vmatpush1.bf16.msra.mxu0 %v507_v16  ;;  %1654 = vmatpush1.bf16.msra.mxu1 %v509_v17  ;;  %v552_v16 = vunpack.c.h.s8.bf16 %v184_v6  ;;  %v554_v17 = vunpack.c.h.s8.bf16 %v186_v7 }
  0xb7   :  { %1225 = vmatprep.subr.bf16.mxu0 %v512_v18  ;;  %1655 = vmatprep.subr.bf16.mxu1 %v514_v19  ;;  %v188_v18 = vld [vmem:[#allocation5 + $0x188] sm:$0xff]  ;;  %v190_v19 = vld [vmem:[#allocation5 + $0x198] sm:$0xff] }
  0xb8   :  { %v556_v22 = vunpack.c.l.s8.bf16 %v188_v18  ;;  %v558_v23 = vunpack.c.l.s8.bf16 %v190_v19 }
  0xba   :  { %1226 = vmatpush1.bf16.msra.mxu0 %v511_v24  ;;  %1656 = vmatpush1.bf16.msra.mxu1 %v513_v25  ;;  %v187_v24 = vld [vmem:[#allocation5 + $0x180] sm:$0xff]  ;;  %v189_v25 = vld [vmem:[#allocation5 + $0x190] sm:$0xff] }
  0xbb   :  { %1227 = vmatprep.subr.bf16.mxu0 %v516_v26  ;;  %1657 = vmatprep.subr.bf16.mxu1 %v518_v27  ;;  %v555_v26 = vunpack.c.l.s8.bf16 %v187_v24  ;;  %v557_v27 = vunpack.c.l.s8.bf16 %v189_v25  ;;  %v559_v32 = vunpack.c.h.s8.bf16 %v187_v24  ;;  %v561_v33 = vunpack.c.h.s8.bf16 %v189_v25 }
  0xbe   :  { %1228 = vmatpush1.bf16.msra.mxu0 %v515_v28  ;;  %1658 = vmatpush1.bf16.msra.mxu1 %v517_v29  ;;  %v560_v28 = vunpack.c.h.s8.bf16 %v188_v18  ;;  %v562_v29 = vunpack.c.h.s8.bf16 %v190_v19 }
  0xbf   :  { %1229 = vmatprep.subr.bf16.mxu0 %v520_v30  ;;  %1659 = vmatprep.subr.bf16.mxu1 %v522_v31  ;;  %v192_v30 = vld [vmem:[#allocation5 + $0x1a8] sm:$0xff]  ;;  %v194_v31 = vld [vmem:[#allocation5 + $0x1b8] sm:$0xff] }
  0xc2   :  { %1230 = vmatpush1.bf16.msra.mxu0 %v519_v34  ;;  %1660 = vmatpush1.bf16.msra.mxu1 %v521_v35  ;;  %v564_v34 = vunpack.c.l.s8.bf16 %v192_v30  ;;  %v566_v35 = vunpack.c.l.s8.bf16 %v194_v31 }
  0xc3   :  { %1242 = vmatprep.subr.bf16.mxu0 %v524_v36  ;;  %1672 = vmatprep.subr.bf16.mxu1 %v526_v37  ;;  %v191_v36 = vld [vmem:[#allocation5 + $0x1a0] sm:$0xff]  ;;  %v193_v37 = vld [vmem:[#allocation5 + $0x1b0] sm:$0xff] }
  0xc4   :  { %v563_v38 = vunpack.c.l.s8.bf16 %v191_v36  ;;  %v565_v39 = vunpack.c.l.s8.bf16 %v193_v37  ;;  %v569_v45 = vunpack.c.h.s8.bf16 %v193_v37 }
  0xc5   :  { %1232 = vmatmul.mubr.bf16.vlgmr.msra.gmra.mrb[0].mxu0 %v2709_v40  ;;  %1662 = vmatmul.mubr.bf16.vlgmr.msra.gmra.mrb[0].mxu1 %v2709_v40  ;;  %v568_v40 = vunpack.c.h.s8.bf16 %v192_v30 }
  0xc6   :  { %1243 = vmatpush1.bf16.msra.mxu0 %v523_v41  ;;  %1673 = vmatpush1.bf16.msra.mxu1 %v525_v42  ;;  %v570_v41 = vunpack.c.h.s8.bf16 %v194_v31  ;;  %v196_v42 = vld [vmem:[#allocation5 + $0x1c8] sm:$0xff] }
  0xc7   :  { %1244 = vmatprep.subr.bf16.mxu0 %v528_v43  ;;  %1674 = vmatprep.subr.bf16.mxu1 %v530_v44  ;;  %v198_v43 = vld [vmem:[#allocation5 + $0x1d8] sm:$0xff]  ;;  %v567_v44 = vunpack.c.h.s8.bf16 %v191_v36  ;;  %v572_v46 = vunpack.c.l.s8.bf16 %v196_v42  ;;  %v576_v52 = vunpack.c.h.s8.bf16 %v196_v42 }
  0xc8   :  { %1274 = vmatprep.mubr.bf16.mxu0 %v2714_v47  ;;  %1704 = vmatprep.mubr.bf16.mxu1 %v2714_v47  ;;  %v574_v47 = vunpack.c.l.s8.bf16 %v198_v43  ;;  %v578_v53 = vunpack.c.h.s8.bf16 %v198_v43 }
  0xca   :  { %1245 = vmatpush1.bf16.msra.mxu0 %v527_v48  ;;  %1675 = vmatpush1.bf16.msra.mxu1 %v529_v49  ;;  %v195_v48 = vld [vmem:[#allocation5 + $0x1c0] sm:$0xff]  ;;  %v197_v49 = vld [vmem:[#allocation5 + $0x1d0] sm:$0xff] }
  0xcb   :  { %1246 = vmatprep.subr.bf16.mxu0 %v532_v50  ;;  %1676 = vmatprep.subr.bf16.mxu1 %v534_v51  ;;  %v571_v50 = vunpack.c.l.s8.bf16 %v195_v48  ;;  %v573_v51 = vunpack.c.l.s8.bf16 %v197_v49 }
  0xce   :  { %1247 = vmatpush1.bf16.msra.mxu0 %v531_v54  ;;  %1677 = vmatpush1.bf16.msra.mxu1 %v533_v55  ;;  %v200_v54 = vld [vmem:[#allocation5 + $0x1e8] sm:$0xff]  ;;  %v202_v55 = vld [vmem:[#allocation5 + $0x1f8] sm:$0xff] }
  0xcf   :  { %1248 = vmatprep.subr.bf16.mxu0 %v536_v56  ;;  %1678 = vmatprep.subr.bf16.mxu1 %v538_v57  ;;  %v575_v56 = vunpack.c.h.s8.bf16 %v195_v48  ;;  %v577_v57 = vunpack.c.h.s8.bf16 %v197_v49  ;;  %v580_v58 = vunpack.c.l.s8.bf16 %v200_v54  ;;  %v582_v59 = vunpack.c.l.s8.bf16 %v202_v55 }
  0xd0   :  { %v584_v0 = vunpack.c.h.s8.bf16 %v200_v54  ;;  %v586_v1 = vunpack.c.h.s8.bf16 %v202_v55 }
  0xd2   :  { %1249 = vmatpush1.bf16.msra.mxu0 %v535_v60  ;;  %1679 = vmatpush1.bf16.msra.mxu1 %v537_v61  ;;  %v199_v60 = vld [vmem:[#allocation5 + $0x1e0] sm:$0xff]  ;;  %v201_v61 = vld [vmem:[#allocation5 + $0x1f0] sm:$0xff] }
  0xd3   :  { %1250 = vmatprep.subr.bf16.mxu0 %v540_v62  ;;  %1680 = vmatprep.subr.bf16.mxu1 %v542_v63  ;;  %v579_v62 = vunpack.c.l.s8.bf16 %v199_v60  ;;  %v581_v63 = vunpack.c.l.s8.bf16 %v201_v61 }
  0xd6   :  { %1251 = vmatpush1.bf16.msra.mxu0 %v539_v2  ;;  %1681 = vmatpush1.bf16.msra.mxu1 %v541_v3  ;;  %v204_v2 = vld [vmem:[#allocation5 + $0x208] sm:$0xff]  ;;  %v206_v3 = vld [vmem:[#allocation5 + $0x218] sm:$0xff] }
  0xd7   :  { %1252 = vmatprep.subr.bf16.mxu0 %v544_v4  ;;  %1682 = vmatprep.subr.bf16.mxu1 %v546_v5  ;;  %v583_v4 = vunpack.c.h.s8.bf16 %v199_v60  ;;  %v585_v5 = vunpack.c.h.s8.bf16 %v201_v61  ;;  %v588_v6 = vunpack.c.l.s8.bf16 %v204_v2  ;;  %v590_v7 = vunpack.c.l.s8.bf16 %v206_v3 }
  0xd8   :  { %v592_v13 = vunpack.c.h.s8.bf16 %v204_v2 }
  0xda   :  { %1253 = vmatpush1.bf16.msra.mxu0 %v543_v8  ;;  %1683 = vmatpush1.bf16.msra.mxu1 %v545_v9  ;;  %v203_v8 = vld [vmem:[#allocation5 + $0x200] sm:$0xff]  ;;  %v205_v9 = vld [vmem:[#allocation5 + $0x210] sm:$0xff] }
  0xdb   :  { %1254 = vmatprep.subr.bf16.mxu0 %v548_v10  ;;  %1684 = vmatprep.subr.bf16.mxu1 %v550_v11  ;;  %v2712_v10 = vld [vmem:[#allocation3 + $0x8] ss:$80 sps:$4 sm:$0xff]   ;;  %v587_v11 = vunpack.c.l.s8.bf16 %v203_v8  ;;  %v589_v12 = vunpack.c.l.s8.bf16 %v205_v9  ;;  %v591_v18 = vunpack.c.h.s8.bf16 %v203_v8  ;;  %v593_v19 = vunpack.c.h.s8.bf16 %v205_v9 }
  0xde   :  { %1255 = vmatpush1.bf16.msra.mxu0 %v547_v14  ;;  %1685 = vmatpush1.bf16.msra.mxu1 %v549_v15  ;;  %v594_v14 = vunpack.c.h.s8.bf16 %v206_v3  ;;  %v208_v15 = vld [vmem:[#allocation5 + $0x228] sm:$0xff] }
  0xdf   :  { %1256 = vmatprep.subr.bf16.mxu0 %v552_v16  ;;  %1686 = vmatprep.subr.bf16.mxu1 %v554_v17  ;;  %v210_v16 = vld [vmem:[#allocation5 + $0x238] sm:$0xff]  ;;  %v2717_v17 = vld [vmem:[#allocation3 + $0x14] ss:$80 sps:$4 sm:$0xff]  }
  0xe2   :  { %1257 = vmatpush1.bf16.msra.mxu0 %v551_v20  ;;  %1687 = vmatpush1.bf16.msra.mxu1 %v553_v21  ;;  %v596_v20 = vunpack.c.l.s8.bf16 %v208_v15  ;;  %v598_v21 = vunpack.c.l.s8.bf16 %v210_v16 }
  0xe3   :  { %1258 = vmatprep.subr.bf16.mxu0 %v556_v22  ;;  %1688 = vmatprep.subr.bf16.mxu1 %v558_v23  ;;  %v207_v22 = vld [vmem:[#allocation5 + $0x220] sm:$0xff]  ;;  %v209_v23 = vld [vmem:[#allocation5 + $0x230] sm:$0xff] }
  0xe4   :  { %v595_v24 = vunpack.c.l.s8.bf16 %v207_v22  ;;  %v597_v25 = vunpack.c.l.s8.bf16 %v209_v23  ;;  %v599_v30 = vunpack.c.h.s8.bf16 %v207_v22  ;;  %v601_v31 = vunpack.c.h.s8.bf16 %v209_v23 }
  0xe6   :  { %1259 = vmatpush1.bf16.msra.mxu0 %v555_v26  ;;  %1689 = vmatpush1.bf16.msra.mxu1 %v557_v27  ;;  %v600_v26 = vunpack.c.h.s8.bf16 %v208_v15  ;;  %v602_v27 = vunpack.c.h.s8.bf16 %v210_v16 }
  0xe7   :  { %1260 = vmatprep.subr.bf16.mxu0 %v560_v28  ;;  %1690 = vmatprep.subr.bf16.mxu1 %v562_v29  ;;  %v212_v28 = vld [vmem:[#allocation5 + $0x248] sm:$0xff]  ;;  %v214_v29 = vld [vmem:[#allocation5 + $0x258] sm:$0xff] }
  0xea   :  { %1261 = vmatpush1.bf16.msra.mxu0 %v559_v32  ;;  %1691 = vmatpush1.bf16.msra.mxu1 %v561_v33  ;;  %v604_v32 = vunpack.c.l.s8.bf16 %v212_v28  ;;  %v606_v33 = vunpack.c.l.s8.bf16 %v214_v29 }
  0xeb   :  { %1262 = vmatprep.subr.bf16.mxu0 %v564_v34  ;;  %1692 = vmatprep.subr.bf16.mxu1 %v566_v35  ;;  %v211_v34 = vld [vmem:[#allocation5 + $0x240] sm:$0xff]  ;;  %v213_v35 = vld [vmem:[#allocation5 + $0x250] sm:$0xff] }
  0xec   :  { %v603_v36 = vunpack.c.l.s8.bf16 %v211_v34  ;;  %v605_v37 = vunpack.c.l.s8.bf16 %v213_v35  ;;  %v607_v42 = vunpack.c.h.s8.bf16 %v211_v34  ;;  %v609_v43 = vunpack.c.h.s8.bf16 %v213_v35 }
  0xee   :  { %1263 = vmatpush1.bf16.msra.mxu0 %v563_v38  ;;  %1693 = vmatpush1.bf16.msra.mxu1 %v565_v39  ;;  %v608_v38 = vunpack.c.h.s8.bf16 %v212_v28  ;;  %v610_v39 = vunpack.c.h.s8.bf16 %v214_v29 }
  0xef   :  { %1264 = vmatprep.subr.bf16.mxu0 %v568_v40  ;;  %1694 = vmatprep.subr.bf16.mxu1 %v570_v41  ;;  %v216_v40 = vld [vmem:[#allocation5 + $0x268] sm:$0xff]  ;;  %v218_v41 = vld [vmem:[#allocation5 + $0x278] sm:$0xff] }
  0xf2   :  { %1265 = vmatpush1.bf16.msra.mxu0 %v567_v44  ;;  %1695 = vmatpush1.bf16.msra.mxu1 %v569_v45  ;;  %v612_v44 = vunpack.c.l.s8.bf16 %v216_v40  ;;  %v614_v45 = vunpack.c.l.s8.bf16 %v218_v41 }
  0xf3   :  { %1266 = vmatprep.subr.bf16.mxu0 %v572_v46  ;;  %1696 = vmatprep.subr.bf16.mxu1 %v574_v47  ;;  %v215_v46 = vld [vmem:[#allocation5 + $0x260] sm:$0xff]  ;;  %v217_v47 = vld [vmem:[#allocation5 + $0x270] sm:$0xff] }
  0xf4   :  { %v611_v48 = vunpack.c.l.s8.bf16 %v215_v46  ;;  %v613_v49 = vunpack.c.l.s8.bf16 %v217_v47  ;;  %v615_v54 = vunpack.c.h.s8.bf16 %v215_v46  ;;  %v617_v55 = vunpack.c.h.s8.bf16 %v217_v47 }
  0xf6   :  { %1267 = vmatpush1.bf16.msra.mxu0 %v571_v50  ;;  %1697 = vmatpush1.bf16.msra.mxu1 %v573_v51  ;;  %v616_v50 = vunpack.c.h.s8.bf16 %v216_v40  ;;  %v618_v51 = vunpack.c.h.s8.bf16 %v218_v41 }
  0xf7   :  { %1268 = vmatprep.subr.bf16.mxu0 %v576_v52  ;;  %1698 = vmatprep.subr.bf16.mxu1 %v578_v53  ;;  %v220_v52 = vld [vmem:[#allocation5 + $0x288] sm:$0xff]  ;;  %v222_v53 = vld [vmem:[#allocation5 + $0x298] sm:$0xff] }
  0xfa   :  { %1269 = vmatpush1.bf16.msra.mxu0 %v575_v56  ;;  %1699 = vmatpush1.bf16.msra.mxu1 %v577_v57  ;;  %v620_v56 = vunpack.c.l.s8.bf16 %v220_v52  ;;  %v622_v57 = vunpack.c.l.s8.bf16 %v222_v53 }
  0xfb   :  { %1270 = vmatprep.subr.bf16.mxu0 %v580_v58  ;;  %1700 = vmatprep.subr.bf16.mxu1 %v582_v59  ;;  %v219_v58 = vld [vmem:[#allocation5 + $0x280] sm:$0xff]  ;;  %v221_v59 = vld [vmem:[#allocation5 + $0x290] sm:$0xff] }
  0xfc   :  { %v619_v60 = vunpack.c.l.s8.bf16 %v219_v58  ;;  %v621_v61 = vunpack.c.l.s8.bf16 %v221_v59  ;;  %v623_v2 = vunpack.c.h.s8.bf16 %v219_v58  ;;  %v625_v3 = vunpack.c.h.s8.bf16 %v221_v59 }
  0xfe   :  { %1271 = vmatpush1.bf16.msra.mxu0 %v579_v62  ;;  %1701 = vmatpush1.bf16.msra.mxu1 %v581_v63  ;;  %v624_v62 = vunpack.c.h.s8.bf16 %v220_v52  ;;  %v626_v63 = vunpack.c.h.s8.bf16 %v222_v53 }
  0xff   :  { %1272 = vmatprep.subr.bf16.mxu0 %v584_v0  ;;  %1702 = vmatprep.subr.bf16.mxu1 %v586_v1  ;;  %v224_v0 = vld [vmem:[#allocation5 + $0x2a8] sm:$0xff]  ;;  %v226_v1 = vld [vmem:[#allocation5 + $0x2b8] sm:$0xff] }
 0x102   :  { %1273 = vmatpush1.bf16.msra.mxu0 %v583_v4  ;;  %1703 = vmatpush1.bf16.msra.mxu1 %v585_v5  ;;  %v628_v4 = vunpack.c.l.s8.bf16 %v224_v0  ;;  %v630_v5 = vunpack.c.l.s8.bf16 %v226_v1 }
 0x103   :  { %1285 = vmatprep.subr.bf16.mxu0 %v588_v6  ;;  %1715 = vmatprep.subr.bf16.mxu1 %v590_v7  ;;  %v223_v6 = vld [vmem:[#allocation5 + $0x2a0] sm:$0xff]  ;;  %v225_v7 = vld [vmem:[#allocation5 + $0x2b0] sm:$0xff] }
 0x104   :  { %v627_v8 = vunpack.c.l.s8.bf16 %v223_v6  ;;  %v629_v9 = vunpack.c.l.s8.bf16 %v225_v7  ;;  %v633_v15 = vunpack.c.h.s8.bf16 %v225_v7 }
 0x105   :  { %1275 = vmatmul.mubr.bf16.vlgmr.msra.gmra.mrb[0].mxu0 %v2712_v10  ;;  %1705 = vmatmul.mubr.bf16.vlgmr.msra.gmra.mrb[0].mxu1 %v2712_v10  ;;  %v632_v10 = vunpack.c.h.s8.bf16 %v224_v0 }
 0x106   :  { %1286 = vmatpush1.bf16.msra.mxu0 %v587_v11  ;;  %1716 = vmatpush1.bf16.msra.mxu1 %v589_v12  ;;  %v634_v11 = vunpack.c.h.s8.bf16 %v226_v1  ;;  %v228_v12 = vld [vmem:[#allocation5 + $0x2c8] sm:$0xff] }
 0x107   :  { %1287 = vmatprep.subr.bf16.mxu0 %v592_v13  ;;  %1717 = vmatprep.subr.bf16.mxu1 %v594_v14  ;;  %v230_v13 = vld [vmem:[#allocation5 + $0x2d8] sm:$0xff]  ;;  %v631_v14 = vunpack.c.h.s8.bf16 %v223_v6  ;;  %v636_v16 = vunpack.c.l.s8.bf16 %v228_v12  ;;  %v640_v22 = vunpack.c.h.s8.bf16 %v228_v12 }
 0x108   :  { %1317 = vmatprep.mubr.bf16.mxu0 %v2717_v17  ;;  %1747 = vmatprep.mubr.bf16.mxu1 %v2717_v17  ;;  %v638_v17 = vunpack.c.l.s8.bf16 %v230_v13  ;;  %v642_v23 = vunpack.c.h.s8.bf16 %v230_v13 }
 0x10a   :  { %1288 = vmatpush1.bf16.msra.mxu0 %v591_v18  ;;  %1718 = vmatpush1.bf16.msra.mxu1 %v593_v19  ;;  %v227_v18 = vld [vmem:[#allocation5 + $0x2c0] sm:$0xff]  ;;  %v229_v19 = vld [vmem:[#allocation5 + $0x2d0] sm:$0xff] }
 0x10b   :  { %1289 = vmatprep.subr.bf16.mxu0 %v596_v20  ;;  %1719 = vmatprep.subr.bf16.mxu1 %v598_v21  ;;  %v635_v20 = vunpack.c.l.s8.bf16 %v227_v18  ;;  %v637_v21 = vunpack.c.l.s8.bf16 %v229_v19 }
 0x10e   :  { %1290 = vmatpush1.bf16.msra.mxu0 %v595_v24  ;;  %1720 = vmatpush1.bf16.msra.mxu1 %v597_v25  ;;  %v232_v24 = vld [vmem:[#allocation5 + $0x2e8] sm:$0xff]  ;;  %v234_v25 = vld [vmem:[#allocation5 + $0x2f8] sm:$0xff] }
 0x10f   :  { %1291 = vmatprep.subr.bf16.mxu0 %v600_v26  ;;  %1721 = vmatprep.subr.bf16.mxu1 %v602_v27  ;;  %v639_v26 = vunpack.c.h.s8.bf16 %v227_v18  ;;  %v641_v27 = vunpack.c.h.s8.bf16 %v229_v19  ;;  %v644_v28 = vunpack.c.l.s8.bf16 %v232_v24  ;;  %v646_v29 = vunpack.c.l.s8.bf16 %v234_v25 }
 0x110   :  { %v648_v34 = vunpack.c.h.s8.bf16 %v232_v24  ;;  %v650_v35 = vunpack.c.h.s8.bf16 %v234_v25 }
 0x112   :  { %1292 = vmatpush1.bf16.msra.mxu0 %v599_v30  ;;  %1722 = vmatpush1.bf16.msra.mxu1 %v601_v31  ;;  %v231_v30 = vld [vmem:[#allocation5 + $0x2e0] sm:$0xff]  ;;  %v233_v31 = vld [vmem:[#allocation5 + $0x2f0] sm:$0xff] }
 0x113   :  { %1293 = vmatprep.subr.bf16.mxu0 %v604_v32  ;;  %1723 = vmatprep.subr.bf16.mxu1 %v606_v33  ;;  %v643_v32 = vunpack.c.l.s8.bf16 %v231_v30  ;;  %v645_v33 = vunpack.c.l.s8.bf16 %v233_v31 }
 0x116   :  { %1294 = vmatpush1.bf16.msra.mxu0 %v603_v36  ;;  %1724 = vmatpush1.bf16.msra.mxu1 %v605_v37  ;;  %v236_v36 = vld [vmem:[#allocation5 + $0x308] sm:$0xff]  ;;  %v238_v37 = vld [vmem:[#allocation5 + $0x318] sm:$0xff] }
 0x117   :  { %1295 = vmatprep.subr.bf16.mxu0 %v608_v38  ;;  %1725 = vmatprep.subr.bf16.mxu1 %v610_v39  ;;  %v647_v38 = vunpack.c.h.s8.bf16 %v231_v30  ;;  %v649_v39 = vunpack.c.h.s8.bf16 %v233_v31  ;;  %v652_v40 = vunpack.c.l.s8.bf16 %v236_v36  ;;  %v654_v41 = vunpack.c.l.s8.bf16 %v238_v37 }
 0x118   :  { %v656_v47 = vunpack.c.h.s8.bf16 %v236_v36 }
 0x11a   :  { %1296 = vmatpush1.bf16.msra.mxu0 %v607_v42  ;;  %1726 = vmatpush1.bf16.msra.mxu1 %v609_v43  ;;  %v235_v42 = vld [vmem:[#allocation5 + $0x300] sm:$0xff]  ;;  %v237_v43 = vld [vmem:[#allocation5 + $0x310] sm:$0xff] }
 0x11b   :  { %1297 = vmatprep.subr.bf16.mxu0 %v612_v44  ;;  %1727 = vmatprep.subr.bf16.mxu1 %v614_v45  ;;  %v2715_v44 = vld [vmem:[#allocation3 + $0x10] ss:$80 sps:$4 sm:$0xff]   ;;  %v651_v45 = vunpack.c.l.s8.bf16 %v235_v42  ;;  %v653_v46 = vunpack.c.l.s8.bf16 %v237_v43  ;;  %v655_v52 = vunpack.c.h.s8.bf16 %v235_v42  ;;  %v657_v53 = vunpack.c.h.s8.bf16 %v237_v43 }
 0x11e   :  { %1298 = vmatpush1.bf16.msra.mxu0 %v611_v48  ;;  %1728 = vmatpush1.bf16.msra.mxu1 %v613_v49  ;;  %v658_v48 = vunpack.c.h.s8.bf16 %v238_v37  ;;  %v240_v49 = vld [vmem:[#allocation5 + $0x328] sm:$0xff] }
 0x11f   :  { %1299 = vmatprep.subr.bf16.mxu0 %v616_v50  ;;  %1729 = vmatprep.subr.bf16.mxu1 %v618_v51  ;;  %v242_v50 = vld [vmem:[#allocation5 + $0x338] sm:$0xff] }
 0x120   :  { %v2720_v51 = vld [vmem:[#allocation3 + $0x1c] ss:$80 sps:$4 sm:$0xff]  }
 0x122   :  { %1300 = vmatpush1.bf16.msra.mxu0 %v615_v54  ;;  %1730 = vmatpush1.bf16.msra.mxu1 %v617_v55  ;;  %v660_v54 = vunpack.c.l.s8.bf16 %v240_v49  ;;  %v662_v55 = vunpack.c.l.s8.bf16 %v242_v50 }
 0x123   :  { %1301 = vmatprep.subr.bf16.mxu0 %v620_v56  ;;  %1731 = vmatprep.subr.bf16.mxu1 %v622_v57  ;;  %v239_v56 = vld [vmem:[#allocation5 + $0x320] sm:$0xff]  ;;  %v241_v57 = vld [vmem:[#allocation5 + $0x330] sm:$0xff] }
 0x124   :  { %v659_v58 = vunpack.c.l.s8.bf16 %v239_v56  ;;  %v661_v59 = vunpack.c.l.s8.bf16 %v241_v57  ;;  %v663_v0 = vunpack.c.h.s8.bf16 %v239_v56  ;;  %v665_v1 = vunpack.c.h.s8.bf16 %v241_v57 }
 0x126   :  { %1302 = vmatpush1.bf16.msra.mxu0 %v619_v60  ;;  %1732 = vmatpush1.bf16.msra.mxu1 %v621_v61  ;;  %v664_v60 = vunpack.c.h.s8.bf16 %v240_v49  ;;  %v666_v61 = vunpack.c.h.s8.bf16 %v242_v50 }
 0x127   :  { %1303 = vmatprep.subr.bf16.mxu0 %v624_v62  ;;  %1733 = vmatprep.subr.bf16.mxu1 %v626_v63  ;;  %v244_v62 = vld [vmem:[#allocation5 + $0x348] sm:$0xff]  ;;  %v246_v63 = vld [vmem:[#allocation5 + $0x358] sm:$0xff] }
 0x12a   :  { %1304 = vmatpush1.bf16.msra.mxu0 %v623_v2  ;;  %1734 = vmatpush1.bf16.msra.mxu1 %v625_v3  ;;  %v668_v2 = vunpack.c.l.s8.bf16 %v244_v62  ;;  %v670_v3 = vunpack.c.l.s8.bf16 %v246_v63 }
 0x12b   :  { %1305 = vmatprep.subr.bf16.mxu0 %v628_v4  ;;  %1735 = vmatprep.subr.bf16.mxu1 %v630_v5  ;;  %v243_v4 = vld [vmem:[#allocation5 + $0x340] sm:$0xff]  ;;  %v245_v5 = vld [vmem:[#allocation5 + $0x350] sm:$0xff] }
 0x12c   :  { %v667_v6 = vunpack.c.l.s8.bf16 %v243_v4  ;;  %v669_v7 = vunpack.c.l.s8.bf16 %v245_v5  ;;  %v671_v12 = vunpack.c.h.s8.bf16 %v243_v4  ;;  %v673_v13 = vunpack.c.h.s8.bf16 %v245_v5 }
 0x12e   :  { %1306 = vmatpush1.bf16.msra.mxu0 %v627_v8  ;;  %1736 = vmatpush1.bf16.msra.mxu1 %v629_v9  ;;  %v672_v8 = vunpack.c.h.s8.bf16 %v244_v62  ;;  %v674_v9 = vunpack.c.h.s8.bf16 %v246_v63 }
 0x12f   :  { %1307 = vmatprep.subr.bf16.mxu0 %v632_v10  ;;  %1737 = vmatprep.subr.bf16.mxu1 %v634_v11  ;;  %v248_v10 = vld [vmem:[#allocation5 + $0x368] sm:$0xff]  ;;  %v250_v11 = vld [vmem:[#allocation5 + $0x378] sm:$0xff] }
 0x132   :  { %1308 = vmatpush1.bf16.msra.mxu0 %v631_v14  ;;  %1738 = vmatpush1.bf16.msra.mxu1 %v633_v15  ;;  %v676_v14 = vunpack.c.l.s8.bf16 %v248_v10  ;;  %v678_v15 = vunpack.c.l.s8.bf16 %v250_v11 }
 0x133   :  { %1309 = vmatprep.subr.bf16.mxu0 %v636_v16  ;;  %1739 = vmatprep.subr.bf16.mxu1 %v638_v17  ;;  %v247_v16 = vld [vmem:[#allocation5 + $0x360] sm:$0xff]  ;;  %v249_v17 = vld [vmem:[#allocation5 + $0x370] sm:$0xff] }
 0x134   :  { %v675_v18 = vunpack.c.l.s8.bf16 %v247_v16  ;;  %v677_v19 = vunpack.c.l.s8.bf16 %v249_v17  ;;  %v679_v24 = vunpack.c.h.s8.bf16 %v247_v16  ;;  %v681_v25 = vunpack.c.h.s8.bf16 %v249_v17 }
 0x136   :  { %1310 = vmatpush1.bf16.msra.mxu0 %v635_v20  ;;  %1740 = vmatpush1.bf16.msra.mxu1 %v637_v21  ;;  %v680_v20 = vunpack.c.h.s8.bf16 %v248_v10  ;;  %v682_v21 = vunpack.c.h.s8.bf16 %v250_v11 }
 0x137   :  { %1311 = vmatprep.subr.bf16.mxu0 %v640_v22  ;;  %1741 = vmatprep.subr.bf16.mxu1 %v642_v23  ;;  %v252_v22 = vld [vmem:[#allocation5 + $0x388] sm:$0xff]  ;;  %v254_v23 = vld [vmem:[#allocation5 + $0x398] sm:$0xff] }
 0x13a   :  { %1312 = vmatpush1.bf16.msra.mxu0 %v639_v26  ;;  %1742 = vmatpush1.bf16.msra.mxu1 %v641_v27  ;;  %v684_v26 = vunpack.c.l.s8.bf16 %v252_v22  ;;  %v686_v27 = vunpack.c.l.s8.bf16 %v254_v23 }
 0x13b   :  { %1313 = vmatprep.subr.bf16.mxu0 %v644_v28  ;;  %1743 = vmatprep.subr.bf16.mxu1 %v646_v29  ;;  %v251_v28 = vld [vmem:[#allocation5 + $0x380] sm:$0xff]  ;;  %v253_v29 = vld [vmem:[#allocation5 + $0x390] sm:$0xff] }
 0x13c   :  { %v683_v30 = vunpack.c.l.s8.bf16 %v251_v28  ;;  %v685_v31 = vunpack.c.l.s8.bf16 %v253_v29  ;;  %v687_v36 = vunpack.c.h.s8.bf16 %v251_v28  ;;  %v689_v37 = vunpack.c.h.s8.bf16 %v253_v29 }
 0x13e   :  { %1314 = vmatpush1.bf16.msra.mxu0 %v643_v32  ;;  %1744 = vmatpush1.bf16.msra.mxu1 %v645_v33  ;;  %v688_v32 = vunpack.c.h.s8.bf16 %v252_v22  ;;  %v690_v33 = vunpack.c.h.s8.bf16 %v254_v23 }
 0x13f   :  { %1315 = vmatprep.subr.bf16.mxu0 %v648_v34  ;;  %1745 = vmatprep.subr.bf16.mxu1 %v650_v35  ;;  %v256_v34 = vld [vmem:[#allocation5 + $0x3a8] sm:$0xff]  ;;  %v258_v35 = vld [vmem:[#allocation5 + $0x3b8] sm:$0xff] }
 0x142   :  { %1316 = vmatpush1.bf16.msra.mxu0 %v647_v38  ;;  %1746 = vmatpush1.bf16.msra.mxu1 %v649_v39  ;;  %v692_v38 = vunpack.c.l.s8.bf16 %v256_v34  ;;  %v694_v39 = vunpack.c.l.s8.bf16 %v258_v35 }
 0x143   :  { %1328 = vmatprep.subr.bf16.mxu0 %v652_v40  ;;  %1758 = vmatprep.subr.bf16.mxu1 %v654_v41  ;;  %v255_v40 = vld [vmem:[#allocation5 + $0x3a0] sm:$0xff]  ;;  %v257_v41 = vld [vmem:[#allocation5 + $0x3b0] sm:$0xff] }
 0x144   :  { %v691_v42 = vunpack.c.l.s8.bf16 %v255_v40  ;;  %v693_v43 = vunpack.c.l.s8.bf16 %v257_v41  ;;  %v697_v49 = vunpack.c.h.s8.bf16 %v257_v41 }
 0x145   :  { %1318 = vmatmul.mubr.bf16.vlgmr.msra.gmra.mrb[0].mxu0 %v2715_v44  ;;  %1748 = vmatmul.mubr.bf16.vlgmr.msra.gmra.mrb[0].mxu1 %v2715_v44  ;;  %v696_v44 = vunpack.c.h.s8.bf16 %v256_v34 }
 0x146   :  { %1329 = vmatpush1.bf16.msra.mxu0 %v651_v45  ;;  %1759 = vmatpush1.bf16.msra.mxu1 %v653_v46  ;;  %v698_v45 = vunpack.c.h.s8.bf16 %v258_v35  ;;  %v260_v46 = vld [vmem:[#allocation5 + $0x3c8] sm:$0xff] }
 0x147   :  { %1330 = vmatprep.subr.bf16.mxu0 %v656_v47  ;;  %1760 = vmatprep.subr.bf16.mxu1 %v658_v48  ;;  %v262_v47 = vld [vmem:[#allocation5 + $0x3d8] sm:$0xff]  ;;  %v695_v48 = vunpack.c.h.s8.bf16 %v255_v40  ;;  %v700_v50 = vunpack.c.l.s8.bf16 %v260_v46  ;;  %v704_v56 = vunpack.c.h.s8.bf16 %v260_v46 }
 0x148   :  { %1360 = vmatprep.mubr.bf16.mxu0 %v2720_v51  ;;  %1790 = vmatprep.mubr.bf16.mxu1 %v2720_v51  ;;  %v702_v51 = vunpack.c.l.s8.bf16 %v262_v47  ;;  %v706_v57 = vunpack.c.h.s8.bf16 %v262_v47 }
 0x14a   :  { %1331 = vmatpush1.bf16.msra.mxu0 %v655_v52  ;;  %1761 = vmatpush1.bf16.msra.mxu1 %v657_v53  ;;  %v259_v52 = vld [vmem:[#allocation5 + $0x3c0] sm:$0xff]  ;;  %v261_v53 = vld [vmem:[#allocation5 + $0x3d0] sm:$0xff] }
 0x14b   :  { %1332 = vmatprep.subr.bf16.mxu0 %v660_v54  ;;  %1762 = vmatprep.subr.bf16.mxu1 %v662_v55  ;;  %v699_v54 = vunpack.c.l.s8.bf16 %v259_v52  ;;  %v701_v55 = vunpack.c.l.s8.bf16 %v261_v53 }
 0x14e   :  { %1333 = vmatpush1.bf16.msra.mxu0 %v659_v58  ;;  %1763 = vmatpush1.bf16.msra.mxu1 %v661_v59  ;;  %v264_v58 = vld [vmem:[#allocation5 + $0x3e8] sm:$0xff]  ;;  %v266_v59 = vld [vmem:[#allocation5 + $0x3f8] sm:$0xff] }
 0x14f   :  { %1334 = vmatprep.subr.bf16.mxu0 %v664_v60  ;;  %1764 = vmatprep.subr.bf16.mxu1 %v666_v61  ;;  %v703_v60 = vunpack.c.h.s8.bf16 %v259_v52  ;;  %v705_v61 = vunpack.c.h.s8.bf16 %v261_v53  ;;  %v708_v62 = vunpack.c.l.s8.bf16 %v264_v58  ;;  %v710_v63 = vunpack.c.l.s8.bf16 %v266_v59 }
 0x150   :  { %v712_v4 = vunpack.c.h.s8.bf16 %v264_v58  ;;  %v714_v5 = vunpack.c.h.s8.bf16 %v266_v59 }
 0x152   :  { %1335 = vmatpush1.bf16.msra.mxu0 %v663_v0  ;;  %1765 = vmatpush1.bf16.msra.mxu1 %v665_v1  ;;  %v263_v0 = vld [vmem:[#allocation5 + $0x3e0] sm:$0xff]  ;;  %v265_v1 = vld [vmem:[#allocation5 + $0x3f0] sm:$0xff] }
 0x153   :  { %1336 = vmatprep.subr.bf16.mxu0 %v668_v2  ;;  %1766 = vmatprep.subr.bf16.mxu1 %v670_v3  ;;  %v707_v2 = vunpack.c.l.s8.bf16 %v263_v0  ;;  %v709_v3 = vunpack.c.l.s8.bf16 %v265_v1 }
 0x156   :  { %1337 = vmatpush1.bf16.msra.mxu0 %v667_v6  ;;  %1767 = vmatpush1.bf16.msra.mxu1 %v669_v7  ;;  %v268_v6 = vld [vmem:[#allocation5 + $0x408] sm:$0xff]  ;;  %v270_v7 = vld [vmem:[#allocation5 + $0x418] sm:$0xff] }
 0x157   :  { %1338 = vmatprep.subr.bf16.mxu0 %v672_v8  ;;  %1768 = vmatprep.subr.bf16.mxu1 %v674_v9  ;;  %v711_v8 = vunpack.c.h.s8.bf16 %v263_v0  ;;  %v713_v9 = vunpack.c.h.s8.bf16 %v265_v1  ;;  %v716_v10 = vunpack.c.l.s8.bf16 %v268_v6  ;;  %v718_v11 = vunpack.c.l.s8.bf16 %v270_v7 }
 0x158   :  { %v720_v17 = vunpack.c.h.s8.bf16 %v268_v6 }
 0x15a   :  { %1339 = vmatpush1.bf16.msra.mxu0 %v671_v12  ;;  %1769 = vmatpush1.bf16.msra.mxu1 %v673_v13  ;;  %v267_v12 = vld [vmem:[#allocation5 + $0x400] sm:$0xff]  ;;  %v269_v13 = vld [vmem:[#allocation5 + $0x410] sm:$0xff] }
 0x15b   :  { %1340 = vmatprep.subr.bf16.mxu0 %v676_v14  ;;  %1770 = vmatprep.subr.bf16.mxu1 %v678_v15  ;;  %v2718_v14 = vld [vmem:[#allocation3 + $0x18] ss:$80 sps:$4 sm:$0xff]   ;;  %v715_v15 = vunpack.c.l.s8.bf16 %v267_v12  ;;  %v717_v16 = vunpack.c.l.s8.bf16 %v269_v13  ;;  %v719_v22 = vunpack.c.h.s8.bf16 %v267_v12  ;;  %v721_v23 = vunpack.c.h.s8.bf16 %v269_v13 }
 0x15e   :  { %1341 = vmatpush1.bf16.msra.mxu0 %v675_v18  ;;  %1771 = vmatpush1.bf16.msra.mxu1 %v677_v19  ;;  %v722_v18 = vunpack.c.h.s8.bf16 %v270_v7  ;;  %v272_v19 = vld [vmem:[#allocation5 + $0x428] sm:$0xff] }
 0x15f   :  { %1342 = vmatprep.subr.bf16.mxu0 %v680_v20  ;;  %1772 = vmatprep.subr.bf16.mxu1 %v682_v21  ;;  %v274_v20 = vld [vmem:[#allocation5 + $0x438] sm:$0xff]  ;;  %v2723_v21 = vld [vmem:[#allocation3 + $0x24] ss:$80 sps:$4 sm:$0xff]  }
 0x162   :  { %1343 = vmatpush1.bf16.msra.mxu0 %v679_v24  ;;  %1773 = vmatpush1.bf16.msra.mxu1 %v681_v25  ;;  %v724_v24 = vunpack.c.l.s8.bf16 %v272_v19  ;;  %v726_v25 = vunpack.c.l.s8.bf16 %v274_v20 }
 0x163   :  { %1344 = vmatprep.subr.bf16.mxu0 %v684_v26  ;;  %1774 = vmatprep.subr.bf16.mxu1 %v686_v27  ;;  %v271_v26 = vld [vmem:[#allocation5 + $0x420] sm:$0xff]  ;;  %v273_v27 = vld [vmem:[#allocation5 + $0x430] sm:$0xff] }
 0x164   :  { %v723_v28 = vunpack.c.l.s8.bf16 %v271_v26  ;;  %v725_v29 = vunpack.c.l.s8.bf16 %v273_v27  ;;  %v727_v34 = vunpack.c.h.s8.bf16 %v271_v26  ;;  %v729_v35 = vunpack.c.h.s8.bf16 %v273_v27 }
 0x166   :  { %1345 = vmatpush1.bf16.msra.mxu0 %v683_v30  ;;  %1775 = vmatpush1.bf16.msra.mxu1 %v685_v31  ;;  %v728_v30 = vunpack.c.h.s8.bf16 %v272_v19  ;;  %v730_v31 = vunpack.c.h.s8.bf16 %v274_v20 }
 0x167   :  { %1346 = vmatprep.subr.bf16.mxu0 %v688_v32  ;;  %1776 = vmatprep.subr.bf16.mxu1 %v690_v33  ;;  %v276_v32 = vld [vmem:[#allocation5 + $0x448] sm:$0xff]  ;;  %v278_v33 = vld [vmem:[#allocation5 + $0x458] sm:$0xff] }
 0x16a   :  { %1347 = vmatpush1.bf16.msra.mxu0 %v687_v36  ;;  %1777 = vmatpush1.bf16.msra.mxu1 %v689_v37  ;;  %v732_v36 = vunpack.c.l.s8.bf16 %v276_v32  ;;  %v734_v37 = vunpack.c.l.s8.bf16 %v278_v33 }
 0x16b   :  { %1348 = vmatprep.subr.bf16.mxu0 %v692_v38  ;;  %1778 = vmatprep.subr.bf16.mxu1 %v694_v39  ;;  %v275_v38 = vld [vmem:[#allocation5 + $0x440] sm:$0xff]  ;;  %v277_v39 = vld [vmem:[#allocation5 + $0x450] sm:$0xff] }
 0x16c   :  { %v731_v40 = vunpack.c.l.s8.bf16 %v275_v38  ;;  %v733_v41 = vunpack.c.l.s8.bf16 %v277_v39  ;;  %v735_v46 = vunpack.c.h.s8.bf16 %v275_v38  ;;  %v737_v47 = vunpack.c.h.s8.bf16 %v277_v39 }
 0x16e   :  { %1349 = vmatpush1.bf16.msra.mxu0 %v691_v42  ;;  %1779 = vmatpush1.bf16.msra.mxu1 %v693_v43  ;;  %v736_v42 = vunpack.c.h.s8.bf16 %v276_v32  ;;  %v738_v43 = vunpack.c.h.s8.bf16 %v278_v33 }
 0x16f   :  { %1350 = vmatprep.subr.bf16.mxu0 %v696_v44  ;;  %1780 = vmatprep.subr.bf16.mxu1 %v698_v45  ;;  %v280_v44 = vld [vmem:[#allocation5 + $0x468] sm:$0xff]  ;;  %v282_v45 = vld [vmem:[#allocation5 + $0x478] sm:$0xff] }
 0x172   :  { %1351 = vmatpush1.bf16.msra.mxu0 %v695_v48  ;;  %1781 = vmatpush1.bf16.msra.mxu1 %v697_v49  ;;  %v740_v48 = vunpack.c.l.s8.bf16 %v280_v44  ;;  %v742_v49 = vunpack.c.l.s8.bf16 %v282_v45 }
 0x173   :  { %1352 = vmatprep.subr.bf16.mxu0 %v700_v50  ;;  %1782 = vmatprep.subr.bf16.mxu1 %v702_v51  ;;  %v279_v50 = vld [vmem:[#allocation5 + $0x460] sm:$0xff]  ;;  %v281_v51 = vld [vmem:[#allocation5 + $0x470] sm:$0xff] }
 0x174   :  { %v739_v52 = vunpack.c.l.s8.bf16 %v279_v50  ;;  %v741_v53 = vunpack.c.l.s8.bf16 %v281_v51  ;;  %v743_v58 = vunpack.c.h.s8.bf16 %v279_v50  ;;  %v745_v59 = vunpack.c.h.s8.bf16 %v281_v51 }
 0x176   :  { %1353 = vmatpush1.bf16.msra.mxu0 %v699_v54  ;;  %1783 = vmatpush1.bf16.msra.mxu1 %v701_v55  ;;  %v744_v54 = vunpack.c.h.s8.bf16 %v280_v44  ;;  %v746_v55 = vunpack.c.h.s8.bf16 %v282_v45 }
 0x177   :  { %1354 = vmatprep.subr.bf16.mxu0 %v704_v56  ;;  %1784 = vmatprep.subr.bf16.mxu1 %v706_v57  ;;  %v284_v56 = vld [vmem:[#allocation5 + $0x488] sm:$0xff]  ;;  %v286_v57 = vld [vmem:[#allocation5 + $0x498] sm:$0xff] }
 0x17a   :  { %1355 = vmatpush1.bf16.msra.mxu0 %v703_v60  ;;  %1785 = vmatpush1.bf16.msra.mxu1 %v705_v61  ;;  %v748_v60 = vunpack.c.l.s8.bf16 %v284_v56  ;;  %v750_v61 = vunpack.c.l.s8.bf16 %v286_v57 }
 0x17b   :  { %1356 = vmatprep.subr.bf16.mxu0 %v708_v62  ;;  %1786 = vmatprep.subr.bf16.mxu1 %v710_v63  ;;  %v283_v62 = vld [vmem:[#allocation5 + $0x480] sm:$0xff]  ;;  %v285_v63 = vld [vmem:[#allocation5 + $0x490] sm:$0xff] }
 0x17c   :  { %v747_v0 = vunpack.c.l.s8.bf16 %v283_v62  ;;  %v749_v1 = vunpack.c.l.s8.bf16 %v285_v63  ;;  %v751_v6 = vunpack.c.h.s8.bf16 %v283_v62  ;;  %v753_v7 = vunpack.c.h.s8.bf16 %v285_v63 }
 0x17e   :  { %1357 = vmatpush1.bf16.msra.mxu0 %v707_v2  ;;  %1787 = vmatpush1.bf16.msra.mxu1 %v709_v3  ;;  %v752_v2 = vunpack.c.h.s8.bf16 %v284_v56  ;;  %v754_v3 = vunpack.c.h.s8.bf16 %v286_v57 }
 0x17f   :  { %1358 = vmatprep.subr.bf16.mxu0 %v712_v4  ;;  %1788 = vmatprep.subr.bf16.mxu1 %v714_v5  ;;  %v288_v4 = vld [vmem:[#allocation5 + $0x4a8] sm:$0xff]  ;;  %v290_v5 = vld [vmem:[#allocation5 + $0x4b8] sm:$0xff] }
 0x182   :  { %1359 = vmatpush1.bf16.msra.mxu0 %v711_v8  ;;  %1789 = vmatpush1.bf16.msra.mxu1 %v713_v9  ;;  %v756_v8 = vunpack.c.l.s8.bf16 %v288_v4  ;;  %v758_v9 = vunpack.c.l.s8.bf16 %v290_v5 }
 0x183   :  { %1371 = vmatprep.subr.bf16.mxu0 %v716_v10  ;;  %1801 = vmatprep.subr.bf16.mxu1 %v718_v11  ;;  %v287_v10 = vld [vmem:[#allocation5 + $0x4a0] sm:$0xff]  ;;  %v289_v11 = vld [vmem:[#allocation5 + $0x4b0] sm:$0xff] }
 0x184   :  { %v755_v12 = vunpack.c.l.s8.bf16 %v287_v10  ;;  %v757_v13 = vunpack.c.l.s8.bf16 %v289_v11  ;;  %v761_v19 = vunpack.c.h.s8.bf16 %v289_v11 }
 0x185   :  { %1361 = vmatmul.mubr.bf16.vlgmr.msra.gmra.mrb[0].mxu0 %v2718_v14  ;;  %1791 = vmatmul.mubr.bf16.vlgmr.msra.gmra.mrb[0].mxu1 %v2718_v14  ;;  %v760_v14 = vunpack.c.h.s8.bf16 %v288_v4 }
 0x186   :  { %1372 = vmatpush1.bf16.msra.mxu0 %v715_v15  ;;  %1802 = vmatpush1.bf16.msra.mxu1 %v717_v16  ;;  %v762_v15 = vunpack.c.h.s8.bf16 %v290_v5  ;;  %v292_v16 = vld [vmem:[#allocation5 + $0x4c8] sm:$0xff] }
 0x187   :  { %1373 = vmatprep.subr.bf16.mxu0 %v720_v17  ;;  %1803 = vmatprep.subr.bf16.mxu1 %v722_v18  ;;  %v294_v17 = vld [vmem:[#allocation5 + $0x4d8] sm:$0xff]  ;;  %v759_v18 = vunpack.c.h.s8.bf16 %v287_v10  ;;  %v764_v20 = vunpack.c.l.s8.bf16 %v292_v16  ;;  %v768_v26 = vunpack.c.h.s8.bf16 %v292_v16 }
 0x188   :  { %1403 = vmatprep.mubr.bf16.mxu0 %v2723_v21  ;;  %1833 = vmatprep.mubr.bf16.mxu1 %v2723_v21  ;;  %v766_v21 = vunpack.c.l.s8.bf16 %v294_v17  ;;  %v770_v27 = vunpack.c.h.s8.bf16 %v294_v17 }
 0x18a   :  { %1374 = vmatpush1.bf16.msra.mxu0 %v719_v22  ;;  %1804 = vmatpush1.bf16.msra.mxu1 %v721_v23  ;;  %v291_v22 = vld [vmem:[#allocation5 + $0x4c0] sm:$0xff]  ;;  %v293_v23 = vld [vmem:[#allocation5 + $0x4d0] sm:$0xff] }
 0x18b   :  { %1375 = vmatprep.subr.bf16.mxu0 %v724_v24  ;;  %1805 = vmatprep.subr.bf16.mxu1 %v726_v25  ;;  %v763_v24 = vunpack.c.l.s8.bf16 %v291_v22  ;;  %v765_v25 = vunpack.c.l.s8.bf16 %v293_v23 }
 0x18e   :  { %1376 = vmatpush1.bf16.msra.mxu0 %v723_v28  ;;  %1806 = vmatpush1.bf16.msra.mxu1 %v725_v29  ;;  %v296_v28 = vld [vmem:[#allocation5 + $0x4e8] sm:$0xff]  ;;  %v298_v29 = vld [vmem:[#allocation5 + $0x4f8] sm:$0xff] }
 0x18f   :  { %1377 = vmatprep.subr.bf16.mxu0 %v728_v30  ;;  %1807 = vmatprep.subr.bf16.mxu1 %v730_v31  ;;  %v767_v30 = vunpack.c.h.s8.bf16 %v291_v22  ;;  %v769_v31 = vunpack.c.h.s8.bf16 %v293_v23  ;;  %v772_v32 = vunpack.c.l.s8.bf16 %v296_v28  ;;  %v774_v33 = vunpack.c.l.s8.bf16 %v298_v29 }
 0x190   :  { %v776_v38 = vunpack.c.h.s8.bf16 %v296_v28  ;;  %v778_v39 = vunpack.c.h.s8.bf16 %v298_v29 }
 0x192   :  { %1378 = vmatpush1.bf16.msra.mxu0 %v727_v34  ;;  %1808 = vmatpush1.bf16.msra.mxu1 %v729_v35  ;;  %v295_v34 = vld [vmem:[#allocation5 + $0x4e0] sm:$0xff]  ;;  %v297_v35 = vld [vmem:[#allocation5 + $0x4f0] sm:$0xff] }
 0x193   :  { %1379 = vmatprep.subr.bf16.mxu0 %v732_v36  ;;  %1809 = vmatprep.subr.bf16.mxu1 %v734_v37  ;;  %v771_v36 = vunpack.c.l.s8.bf16 %v295_v34  ;;  %v773_v37 = vunpack.c.l.s8.bf16 %v297_v35 }
 0x196   :  { %1380 = vmatpush1.bf16.msra.mxu0 %v731_v40  ;;  %1810 = vmatpush1.bf16.msra.mxu1 %v733_v41  ;;  %v300_v40 = vld [vmem:[#allocation5 + $0x508] sm:$0xff]  ;;  %v302_v41 = vld [vmem:[#allocation5 + $0x518] sm:$0xff] }
 0x197   :  { %1381 = vmatprep.subr.bf16.mxu0 %v736_v42  ;;  %1811 = vmatprep.subr.bf16.mxu1 %v738_v43  ;;  %v775_v42 = vunpack.c.h.s8.bf16 %v295_v34  ;;  %v777_v43 = vunpack.c.h.s8.bf16 %v297_v35  ;;  %v780_v44 = vunpack.c.l.s8.bf16 %v300_v40  ;;  %v782_v45 = vunpack.c.l.s8.bf16 %v302_v41 }
 0x198   :  { %v784_v51 = vunpack.c.h.s8.bf16 %v300_v40 }
 0x19a   :  { %1382 = vmatpush1.bf16.msra.mxu0 %v735_v46  ;;  %1812 = vmatpush1.bf16.msra.mxu1 %v737_v47  ;;  %v299_v46 = vld [vmem:[#allocation5 + $0x500] sm:$0xff]  ;;  %v301_v47 = vld [vmem:[#allocation5 + $0x510] sm:$0xff] }
 0x19b   :  { %1383 = vmatprep.subr.bf16.mxu0 %v740_v48  ;;  %1813 = vmatprep.subr.bf16.mxu1 %v742_v49  ;;  %v2721_v48 = vld [vmem:[#allocation3 + $0x20] ss:$80 sps:$4 sm:$0xff]   ;;  %v779_v49 = vunpack.c.l.s8.bf16 %v299_v46  ;;  %v781_v50 = vunpack.c.l.s8.bf16 %v301_v47  ;;  %v783_v56 = vunpack.c.h.s8.bf16 %v299_v46  ;;  %v785_v57 = vunpack.c.h.s8.bf16 %v301_v47 }
 0x19e   :  { %1384 = vmatpush1.bf16.msra.mxu0 %v739_v52  ;;  %1814 = vmatpush1.bf16.msra.mxu1 %v741_v53  ;;  %v786_v52 = vunpack.c.h.s8.bf16 %v302_v41  ;;  %v304_v53 = vld [vmem:[#allocation5 + $0x528] sm:$0xff] }
 0x19f   :  { %1385 = vmatprep.subr.bf16.mxu0 %v744_v54  ;;  %1815 = vmatprep.subr.bf16.mxu1 %v746_v55  ;;  %v306_v54 = vld [vmem:[#allocation5 + $0x538] sm:$0xff] }
 0x1a0   :  { %v2726_v55 = vld [vmem:[#allocation3 + $0x2c] ss:$80 sps:$4 sm:$0xff]  }
 0x1a2   :  { %1386 = vmatpush1.bf16.msra.mxu0 %v743_v58  ;;  %1816 = vmatpush1.bf16.msra.mxu1 %v745_v59  ;;  %v788_v58 = vunpack.c.l.s8.bf16 %v304_v53  ;;  %v790_v59 = vunpack.c.l.s8.bf16 %v306_v54 }
 0x1a3   :  { %1387 = vmatprep.subr.bf16.mxu0 %v748_v60  ;;  %1817 = vmatprep.subr.bf16.mxu1 %v750_v61  ;;  %v303_v60 = vld [vmem:[#allocation5 + $0x520] sm:$0xff]  ;;  %v305_v61 = vld [vmem:[#allocation5 + $0x530] sm:$0xff] }
 0x1a4   :  { %v787_v62 = vunpack.c.l.s8.bf16 %v303_v60  ;;  %v789_v63 = vunpack.c.l.s8.bf16 %v305_v61  ;;  %v791_v4 = vunpack.c.h.s8.bf16 %v303_v60  ;;  %v793_v5 = vunpack.c.h.s8.bf16 %v305_v61 }
 0x1a6   :  { %1388 = vmatpush1.bf16.msra.mxu0 %v747_v0  ;;  %1818 = vmatpush1.bf16.msra.mxu1 %v749_v1  ;;  %v792_v0 = vunpack.c.h.s8.bf16 %v304_v53  ;;  %v794_v1 = vunpack.c.h.s8.bf16 %v306_v54 }
 0x1a7   :  { %1389 = vmatprep.subr.bf16.mxu0 %v752_v2  ;;  %1819 = vmatprep.subr.bf16.mxu1 %v754_v3  ;;  %v308_v2 = vld [vmem:[#allocation5 + $0x548] sm:$0xff]  ;;  %v310_v3 = vld [vmem:[#allocation5 + $0x558] sm:$0xff] }
 0x1aa   :  { %1390 = vmatpush1.bf16.msra.mxu0 %v751_v6  ;;  %1820 = vmatpush1.bf16.msra.mxu1 %v753_v7  ;;  %v796_v6 = vunpack.c.l.s8.bf16 %v308_v2  ;;  %v798_v7 = vunpack.c.l.s8.bf16 %v310_v3 }
 0x1ab   :  { %1391 = vmatprep.subr.bf16.mxu0 %v756_v8  ;;  %1821 = vmatprep.subr.bf16.mxu1 %v758_v9  ;;  %v307_v8 = vld [vmem:[#allocation5 + $0x540] sm:$0xff]  ;;  %v309_v9 = vld [vmem:[#allocation5 + $0x550] sm:$0xff] }
 0x1ac   :  { %v795_v10 = vunpack.c.l.s8.bf16 %v307_v8  ;;  %v797_v11 = vunpack.c.l.s8.bf16 %v309_v9  ;;  %v799_v16 = vunpack.c.h.s8.bf16 %v307_v8  ;;  %v801_v17 = vunpack.c.h.s8.bf16 %v309_v9 }
 0x1ae   :  { %1392 = vmatpush1.bf16.msra.mxu0 %v755_v12  ;;  %1822 = vmatpush1.bf16.msra.mxu1 %v757_v13  ;;  %v800_v12 = vunpack.c.h.s8.bf16 %v308_v2  ;;  %v802_v13 = vunpack.c.h.s8.bf16 %v310_v3 }
 0x1af   :  { %1393 = vmatprep.subr.bf16.mxu0 %v760_v14  ;;  %1823 = vmatprep.subr.bf16.mxu1 %v762_v15  ;;  %v312_v14 = vld [vmem:[#allocation5 + $0x568] sm:$0xff]  ;;  %v314_v15 = vld [vmem:[#allocation5 + $0x578] sm:$0xff] }
 0x1b2   :  { %1394 = vmatpush1.bf16.msra.mxu0 %v759_v18  ;;  %1824 = vmatpush1.bf16.msra.mxu1 %v761_v19  ;;  %v804_v18 = vunpack.c.l.s8.bf16 %v312_v14  ;;  %v806_v19 = vunpack.c.l.s8.bf16 %v314_v15 }
 0x1b3   :  { %1395 = vmatprep.subr.bf16.mxu0 %v764_v20  ;;  %1825 = vmatprep.subr.bf16.mxu1 %v766_v21  ;;  %v311_v20 = vld [vmem:[#allocation5 + $0x560] sm:$0xff]  ;;  %v313_v21 = vld [vmem:[#allocation5 + $0x570] sm:$0xff] }
 0x1b4   :  { %v803_v22 = vunpack.c.l.s8.bf16 %v311_v20  ;;  %v805_v23 = vunpack.c.l.s8.bf16 %v313_v21  ;;  %v807_v28 = vunpack.c.h.s8.bf16 %v311_v20  ;;  %v809_v29 = vunpack.c.h.s8.bf16 %v313_v21 }
 0x1b6   :  { %1396 = vmatpush1.bf16.msra.mxu0 %v763_v24  ;;  %1826 = vmatpush1.bf16.msra.mxu1 %v765_v25  ;;  %v808_v24 = vunpack.c.h.s8.bf16 %v312_v14  ;;  %v810_v25 = vunpack.c.h.s8.bf16 %v314_v15 }
 0x1b7   :  { %1397 = vmatprep.subr.bf16.mxu0 %v768_v26  ;;  %1827 = vmatprep.subr.bf16.mxu1 %v770_v27  ;;  %v316_v26 = vld [vmem:[#allocation5 + $0x588] sm:$0xff]  ;;  %v318_v27 = vld [vmem:[#allocation5 + $0x598] sm:$0xff] }
 0x1ba   :  { %1398 = vmatpush1.bf16.msra.mxu0 %v767_v30  ;;  %1828 = vmatpush1.bf16.msra.mxu1 %v769_v31  ;;  %v812_v30 = vunpack.c.l.s8.bf16 %v316_v26  ;;  %v814_v31 = vunpack.c.l.s8.bf16 %v318_v27 }
 0x1bb   :  { %1399 = vmatprep.subr.bf16.mxu0 %v772_v32  ;;  %1829 = vmatprep.subr.bf16.mxu1 %v774_v33  ;;  %v315_v32 = vld [vmem:[#allocation5 + $0x580] sm:$0xff]  ;;  %v317_v33 = vld [vmem:[#allocation5 + $0x590] sm:$0xff] }
 0x1bc   :  { %v811_v34 = vunpack.c.l.s8.bf16 %v315_v32  ;;  %v813_v35 = vunpack.c.l.s8.bf16 %v317_v33  ;;  %v815_v40 = vunpack.c.h.s8.bf16 %v315_v32  ;;  %v817_v41 = vunpack.c.h.s8.bf16 %v317_v33 }
 0x1be   :  { %1400 = vmatpush1.bf16.msra.mxu0 %v771_v36  ;;  %1830 = vmatpush1.bf16.msra.mxu1 %v773_v37  ;;  %v816_v36 = vunpack.c.h.s8.bf16 %v316_v26  ;;  %v818_v37 = vunpack.c.h.s8.bf16 %v318_v27 }
 0x1bf   :  { %1401 = vmatprep.subr.bf16.mxu0 %v776_v38  ;;  %1831 = vmatprep.subr.bf16.mxu1 %v778_v39  ;;  %v320_v38 = vld [vmem:[#allocation5 + $0x5a8] sm:$0xff]  ;;  %v322_v39 = vld [vmem:[#allocation5 + $0x5b8] sm:$0xff] }
 0x1c2   :  { %1402 = vmatpush1.bf16.msra.mxu0 %v775_v42  ;;  %1832 = vmatpush1.bf16.msra.mxu1 %v777_v43  ;;  %v820_v42 = vunpack.c.l.s8.bf16 %v320_v38  ;;  %v822_v43 = vunpack.c.l.s8.bf16 %v322_v39 }
 0x1c3   :  { %1414 = vmatprep.subr.bf16.mxu0 %v780_v44  ;;  %1844 = vmatprep.subr.bf16.mxu1 %v782_v45  ;;  %v319_v44 = vld [vmem:[#allocation5 + $0x5a0] sm:$0xff]  ;;  %v321_v45 = vld [vmem:[#allocation5 + $0x5b0] sm:$0xff] }
 0x1c4   :  { %v819_v46 = vunpack.c.l.s8.bf16 %v319_v44  ;;  %v821_v47 = vunpack.c.l.s8.bf16 %v321_v45  ;;  %v825_v53 = vunpack.c.h.s8.bf16 %v321_v45 }
 0x1c5   :  { %1404 = vmatmul.mubr.bf16.vlgmr.msra.gmra.mrb[0].mxu0 %v2721_v48  ;;  %1834 = vmatmul.mubr.bf16.vlgmr.msra.gmra.mrb[0].mxu1 %v2721_v48  ;;  %v824_v48 = vunpack.c.h.s8.bf16 %v320_v38 }
 0x1c6   :  { %1415 = vmatpush1.bf16.msra.mxu0 %v779_v49  ;;  %1845 = vmatpush1.bf16.msra.mxu1 %v781_v50  ;;  %v826_v49 = vunpack.c.h.s8.bf16 %v322_v39  ;;  %v324_v50 = vld [vmem:[#allocation5 + $0x5c8] sm:$0xff] }
 0x1c7   :  { %1416 = vmatprep.subr.bf16.mxu0 %v784_v51  ;;  %1846 = vmatprep.subr.bf16.mxu1 %v786_v52  ;;  %v326_v51 = vld [vmem:[#allocation5 + $0x5d8] sm:$0xff]  ;;  %v823_v52 = vunpack.c.h.s8.bf16 %v319_v44  ;;  %v828_v54 = vunpack.c.l.s8.bf16 %v324_v50  ;;  %v832_v60 = vunpack.c.h.s8.bf16 %v324_v50 }
 0x1c8   :  { %1446 = vmatprep.mubr.bf16.mxu0 %v2726_v55  ;;  %1876 = vmatprep.mubr.bf16.mxu1 %v2726_v55  ;;  %v830_v55 = vunpack.c.l.s8.bf16 %v326_v51  ;;  %v834_v61 = vunpack.c.h.s8.bf16 %v326_v51 }
 0x1ca   :  { %1417 = vmatpush1.bf16.msra.mxu0 %v783_v56  ;;  %1847 = vmatpush1.bf16.msra.mxu1 %v785_v57  ;;  %v323_v56 = vld [vmem:[#allocation5 + $0x5c0] sm:$0xff]  ;;  %v325_v57 = vld [vmem:[#allocation5 + $0x5d0] sm:$0xff] }
 0x1cb   :  { %1418 = vmatprep.subr.bf16.mxu0 %v788_v58  ;;  %1848 = vmatprep.subr.bf16.mxu1 %v790_v59  ;;  %v827_v58 = vunpack.c.l.s8.bf16 %v323_v56  ;;  %v829_v59 = vunpack.c.l.s8.bf16 %v325_v57 }
 0x1ce   :  { %1419 = vmatpush1.bf16.msra.mxu0 %v787_v62  ;;  %1849 = vmatpush1.bf16.msra.mxu1 %v789_v63  ;;  %v328_v62 = vld [vmem:[#allocation5 + $0x5e8] sm:$0xff]  ;;  %v330_v63 = vld [vmem:[#allocation5 + $0x5f8] sm:$0xff] }
 0x1cf   :  { %1420 = vmatprep.subr.bf16.mxu0 %v792_v0  ;;  %1850 = vmatprep.subr.bf16.mxu1 %v794_v1  ;;  %v831_v0 = vunpack.c.h.s8.bf16 %v323_v56  ;;  %v833_v1 = vunpack.c.h.s8.bf16 %v325_v57  ;;  %v836_v2 = vunpack.c.l.s8.bf16 %v328_v62  ;;  %v838_v3 = vunpack.c.l.s8.bf16 %v330_v63 }
 0x1d0   :  { %v840_v8 = vunpack.c.h.s8.bf16 %v328_v62  ;;  %v842_v9 = vunpack.c.h.s8.bf16 %v330_v63 }
 0x1d2   :  { %1421 = vmatpush1.bf16.msra.mxu0 %v791_v4  ;;  %1851 = vmatpush1.bf16.msra.mxu1 %v793_v5  ;;  %v327_v4 = vld [vmem:[#allocation5 + $0x5e0] sm:$0xff]  ;;  %v329_v5 = vld [vmem:[#allocation5 + $0x5f0] sm:$0xff] }
 0x1d3   :  { %1422 = vmatprep.subr.bf16.mxu0 %v796_v6  ;;  %1852 = vmatprep.subr.bf16.mxu1 %v798_v7  ;;  %v835_v6 = vunpack.c.l.s8.bf16 %v327_v4  ;;  %v837_v7 = vunpack.c.l.s8.bf16 %v329_v5 }
 0x1d6   :  { %1423 = vmatpush1.bf16.msra.mxu0 %v795_v10  ;;  %1853 = vmatpush1.bf16.msra.mxu1 %v797_v11  ;;  %v332_v10 = vld [vmem:[#allocation5 + $0x608] sm:$0xff]  ;;  %v334_v11 = vld [vmem:[#allocation5 + $0x618] sm:$0xff] }
 0x1d7   :  { %1424 = vmatprep.subr.bf16.mxu0 %v800_v12  ;;  %1854 = vmatprep.subr.bf16.mxu1 %v802_v13  ;;  %v839_v12 = vunpack.c.h.s8.bf16 %v327_v4  ;;  %v841_v13 = vunpack.c.h.s8.bf16 %v329_v5  ;;  %v844_v14 = vunpack.c.l.s8.bf16 %v332_v10  ;;  %v846_v15 = vunpack.c.l.s8.bf16 %v334_v11 }
 0x1d8   :  { %v848_v21 = vunpack.c.h.s8.bf16 %v332_v10 }
 0x1da   :  { %1425 = vmatpush1.bf16.msra.mxu0 %v799_v16  ;;  %1855 = vmatpush1.bf16.msra.mxu1 %v801_v17  ;;  %v331_v16 = vld [vmem:[#allocation5 + $0x600] sm:$0xff]  ;;  %v333_v17 = vld [vmem:[#allocation5 + $0x610] sm:$0xff] }
 0x1db   :  { %1426 = vmatprep.subr.bf16.mxu0 %v804_v18  ;;  %1856 = vmatprep.subr.bf16.mxu1 %v806_v19  ;;  %v2724_v18 = vld [vmem:[#allocation3 + $0x28] ss:$80 sps:$4 sm:$0xff]   ;;  %v843_v19 = vunpack.c.l.s8.bf16 %v331_v16  ;;  %v845_v20 = vunpack.c.l.s8.bf16 %v333_v17  ;;  %v847_v26 = vunpack.c.h.s8.bf16 %v331_v16  ;;  %v849_v27 = vunpack.c.h.s8.bf16 %v333_v17 }
 0x1de   :  { %1427 = vmatpush1.bf16.msra.mxu0 %v803_v22  ;;  %1857 = vmatpush1.bf16.msra.mxu1 %v805_v23  ;;  %v850_v22 = vunpack.c.h.s8.bf16 %v334_v11  ;;  %v336_v23 = vld [vmem:[#allocation5 + $0x628] sm:$0xff] }
 0x1df   :  { %1428 = vmatprep.subr.bf16.mxu0 %v808_v24  ;;  %1858 = vmatprep.subr.bf16.mxu1 %v810_v25  ;;  %v338_v24 = vld [vmem:[#allocation5 + $0x638] sm:$0xff]  ;;  %v2729_v25 = vld [vmem:[#allocation3 + $0x34] ss:$80 sps:$4 sm:$0xff]  }
 0x1e2   :  { %1429 = vmatpush1.bf16.msra.mxu0 %v807_v28  ;;  %1859 = vmatpush1.bf16.msra.mxu1 %v809_v29  ;;  %v852_v28 = vunpack.c.l.s8.bf16 %v336_v23  ;;  %v854_v29 = vunpack.c.l.s8.bf16 %v338_v24 }
 0x1e3   :  { %1430 = vmatprep.subr.bf16.mxu0 %v812_v30  ;;  %1860 = vmatprep.subr.bf16.mxu1 %v814_v31  ;;  %v335_v30 = vld [vmem:[#allocation5 + $0x620] sm:$0xff]  ;;  %v337_v31 = vld [vmem:[#allocation5 + $0x630] sm:$0xff] }
 0x1e4   :  { %v851_v32 = vunpack.c.l.s8.bf16 %v335_v30  ;;  %v853_v33 = vunpack.c.l.s8.bf16 %v337_v31  ;;  %v855_v38 = vunpack.c.h.s8.bf16 %v335_v30  ;;  %v857_v39 = vunpack.c.h.s8.bf16 %v337_v31 }
 0x1e6   :  { %1431 = vmatpush1.bf16.msra.mxu0 %v811_v34  ;;  %1861 = vmatpush1.bf16.msra.mxu1 %v813_v35  ;;  %v856_v34 = vunpack.c.h.s8.bf16 %v336_v23  ;;  %v858_v35 = vunpack.c.h.s8.bf16 %v338_v24 }
 0x1e7   :  { %1432 = vmatprep.subr.bf16.mxu0 %v816_v36  ;;  %1862 = vmatprep.subr.bf16.mxu1 %v818_v37  ;;  %v340_v36 = vld [vmem:[#allocation5 + $0x648] sm:$0xff]  ;;  %v342_v37 = vld [vmem:[#allocation5 + $0x658] sm:$0xff] }
 0x1ea   :  { %1433 = vmatpush1.bf16.msra.mxu0 %v815_v40  ;;  %1863 = vmatpush1.bf16.msra.mxu1 %v817_v41  ;;  %v860_v40 = vunpack.c.l.s8.bf16 %v340_v36  ;;  %v862_v41 = vunpack.c.l.s8.bf16 %v342_v37 }
 0x1eb   :  { %1434 = vmatprep.subr.bf16.mxu0 %v820_v42  ;;  %1864 = vmatprep.subr.bf16.mxu1 %v822_v43  ;;  %v339_v42 = vld [vmem:[#allocation5 + $0x640] sm:$0xff]  ;;  %v341_v43 = vld [vmem:[#allocation5 + $0x650] sm:$0xff] }
 0x1ec   :  { %v859_v44 = vunpack.c.l.s8.bf16 %v339_v42  ;;  %v861_v45 = vunpack.c.l.s8.bf16 %v341_v43  ;;  %v863_v50 = vunpack.c.h.s8.bf16 %v339_v42  ;;  %v865_v51 = vunpack.c.h.s8.bf16 %v341_v43 }
 0x1ee   :  { %1435 = vmatpush1.bf16.msra.mxu0 %v819_v46  ;;  %1865 = vmatpush1.bf16.msra.mxu1 %v821_v47  ;;  %v864_v46 = vunpack.c.h.s8.bf16 %v340_v36  ;;  %v866_v47 = vunpack.c.h.s8.bf16 %v342_v37 }
 0x1ef   :  { %1436 = vmatprep.subr.bf16.mxu0 %v824_v48  ;;  %1866 = vmatprep.subr.bf16.mxu1 %v826_v49  ;;  %v344_v48 = vld [vmem:[#allocation5 + $0x668] sm:$0xff]  ;;  %v346_v49 = vld [vmem:[#allocation5 + $0x678] sm:$0xff] }
 0x1f2   :  { %1437 = vmatpush1.bf16.msra.mxu0 %v823_v52  ;;  %1867 = vmatpush1.bf16.msra.mxu1 %v825_v53  ;;  %v868_v52 = vunpack.c.l.s8.bf16 %v344_v48  ;;  %v870_v53 = vunpack.c.l.s8.bf16 %v346_v49 }
 0x1f3   :  { %1438 = vmatprep.subr.bf16.mxu0 %v828_v54  ;;  %1868 = vmatprep.subr.bf16.mxu1 %v830_v55  ;;  %v343_v54 = vld [vmem:[#allocation5 + $0x660] sm:$0xff]  ;;  %v345_v55 = vld [vmem:[#allocation5 + $0x670] sm:$0xff] }
 0x1f4   :  { %v867_v56 = vunpack.c.l.s8.bf16 %v343_v54  ;;  %v869_v57 = vunpack.c.l.s8.bf16 %v345_v55  ;;  %v871_v62 = vunpack.c.h.s8.bf16 %v343_v54  ;;  %v873_v63 = vunpack.c.h.s8.bf16 %v345_v55 }
 0x1f6   :  { %1439 = vmatpush1.bf16.msra.mxu0 %v827_v58  ;;  %1869 = vmatpush1.bf16.msra.mxu1 %v829_v59  ;;  %v872_v58 = vunpack.c.h.s8.bf16 %v344_v48  ;;  %v874_v59 = vunpack.c.h.s8.bf16 %v346_v49 }
 0x1f7   :  { %1440 = vmatprep.subr.bf16.mxu0 %v832_v60  ;;  %1870 = vmatprep.subr.bf16.mxu1 %v834_v61  ;;  %v348_v60 = vld [vmem:[#allocation5 + $0x688] sm:$0xff]  ;;  %v350_v61 = vld [vmem:[#allocation5 + $0x698] sm:$0xff] }
 0x1fa   :  { %1441 = vmatpush1.bf16.msra.mxu0 %v831_v0  ;;  %1871 = vmatpush1.bf16.msra.mxu1 %v833_v1  ;;  %v876_v0 = vunpack.c.l.s8.bf16 %v348_v60  ;;  %v878_v1 = vunpack.c.l.s8.bf16 %v350_v61 }
 0x1fb   :  { %1442 = vmatprep.subr.bf16.mxu0 %v836_v2  ;;  %1872 = vmatprep.subr.bf16.mxu1 %v838_v3  ;;  %v347_v2 = vld [vmem:[#allocation5 + $0x680] sm:$0xff]  ;;  %v349_v3 = vld [vmem:[#allocation5 + $0x690] sm:$0xff] }
 0x1fc   :  { %v875_v4 = vunpack.c.l.s8.bf16 %v347_v2  ;;  %v877_v5 = vunpack.c.l.s8.bf16 %v349_v3  ;;  %v879_v10 = vunpack.c.h.s8.bf16 %v347_v2  ;;  %v881_v11 = vunpack.c.h.s8.bf16 %v349_v3 }
 0x1fe   :  { %1443 = vmatpush1.bf16.msra.mxu0 %v835_v6  ;;  %1873 = vmatpush1.bf16.msra.mxu1 %v837_v7  ;;  %v880_v6 = vunpack.c.h.s8.bf16 %v348_v60  ;;  %v882_v7 = vunpack.c.h.s8.bf16 %v350_v61 }
 0x1ff   :  { %1444 = vmatprep.subr.bf16.mxu0 %v840_v8  ;;  %1874 = vmatprep.subr.bf16.mxu1 %v842_v9  ;;  %v352_v8 = vld [vmem:[#allocation5 + $0x6a8] sm:$0xff]  ;;  %v354_v9 = vld [vmem:[#allocation5 + $0x6b8] sm:$0xff] }
 0x202   :  { %1445 = vmatpush1.bf16.msra.mxu0 %v839_v12  ;;  %1875 = vmatpush1.bf16.msra.mxu1 %v841_v13  ;;  %v884_v12 = vunpack.c.l.s8.bf16 %v352_v8  ;;  %v886_v13 = vunpack.c.l.s8.bf16 %v354_v9 }
 0x203   :  { %1457 = vmatprep.subr.bf16.mxu0 %v844_v14  ;;  %1887 = vmatprep.subr.bf16.mxu1 %v846_v15  ;;  %v351_v14 = vld [vmem:[#allocation5 + $0x6a0] sm:$0xff]  ;;  %v353_v15 = vld [vmem:[#allocation5 + $0x6b0] sm:$0xff] }
 0x204   :  { %v883_v16 = vunpack.c.l.s8.bf16 %v351_v14  ;;  %v885_v17 = vunpack.c.l.s8.bf16 %v353_v15  ;;  %v889_v23 = vunpack.c.h.s8.bf16 %v353_v15 }
 0x205   :  { %1447 = vmatmul.mubr.bf16.vlgmr.msra.gmra.mrb[0].mxu0 %v2724_v18  ;;  %1877 = vmatmul.mubr.bf16.vlgmr.msra.gmra.mrb[0].mxu1 %v2724_v18  ;;  %v888_v18 = vunpack.c.h.s8.bf16 %v352_v8 }
 0x206   :  { %1458 = vmatpush1.bf16.msra.mxu0 %v843_v19  ;;  %1888 = vmatpush1.bf16.msra.mxu1 %v845_v20  ;;  %v890_v19 = vunpack.c.h.s8.bf16 %v354_v9  ;;  %v356_v20 = vld [vmem:[#allocation5 + $0x6c8] sm:$0xff] }
 0x207   :  { %1459 = vmatprep.subr.bf16.mxu0 %v848_v21  ;;  %1889 = vmatprep.subr.bf16.mxu1 %v850_v22  ;;  %v358_v21 = vld [vmem:[#allocation5 + $0x6d8] sm:$0xff]  ;;  %v887_v22 = vunpack.c.h.s8.bf16 %v351_v14  ;;  %v892_v24 = vunpack.c.l.s8.bf16 %v356_v20  ;;  %v896_v30 = vunpack.c.h.s8.bf16 %v356_v20 }
 0x208   :  { %1489 = vmatprep.mubr.bf16.mxu0 %v2729_v25  ;;  %1919 = vmatprep.mubr.bf16.mxu1 %v2729_v25  ;;  %v894_v25 = vunpack.c.l.s8.bf16 %v358_v21  ;;  %v898_v31 = vunpack.c.h.s8.bf16 %v358_v21 }
 0x20a   :  { %1460 = vmatpush1.bf16.msra.mxu0 %v847_v26  ;;  %1890 = vmatpush1.bf16.msra.mxu1 %v849_v27  ;;  %v355_v26 = vld [vmem:[#allocation5 + $0x6c0] sm:$0xff]  ;;  %v357_v27 = vld [vmem:[#allocation5 + $0x6d0] sm:$0xff] }
 0x20b   :  { %1461 = vmatprep.subr.bf16.mxu0 %v852_v28  ;;  %1891 = vmatprep.subr.bf16.mxu1 %v854_v29  ;;  %v891_v28 = vunpack.c.l.s8.bf16 %v355_v26  ;;  %v893_v29 = vunpack.c.l.s8.bf16 %v357_v27 }
 0x20e   :  { %1462 = vmatpush1.bf16.msra.mxu0 %v851_v32  ;;  %1892 = vmatpush1.bf16.msra.mxu1 %v853_v33  ;;  %v360_v32 = vld [vmem:[#allocation5 + $0x6e8] sm:$0xff]  ;;  %v362_v33 = vld [vmem:[#allocation5 + $0x6f8] sm:$0xff] }
 0x20f   :  { %1463 = vmatprep.subr.bf16.mxu0 %v856_v34  ;;  %1893 = vmatprep.subr.bf16.mxu1 %v858_v35  ;;  %v895_v34 = vunpack.c.h.s8.bf16 %v355_v26  ;;  %v897_v35 = vunpack.c.h.s8.bf16 %v357_v27  ;;  %v900_v36 = vunpack.c.l.s8.bf16 %v360_v32  ;;  %v902_v37 = vunpack.c.l.s8.bf16 %v362_v33 }
 0x210   :  { %v904_v42 = vunpack.c.h.s8.bf16 %v360_v32  ;;  %v906_v43 = vunpack.c.h.s8.bf16 %v362_v33 }
 0x212   :  { %1464 = vmatpush1.bf16.msra.mxu0 %v855_v38  ;;  %1894 = vmatpush1.bf16.msra.mxu1 %v857_v39  ;;  %v359_v38 = vld [vmem:[#allocation5 + $0x6e0] sm:$0xff]  ;;  %v361_v39 = vld [vmem:[#allocation5 + $0x6f0] sm:$0xff] }
 0x213   :  { %1465 = vmatprep.subr.bf16.mxu0 %v860_v40  ;;  %1895 = vmatprep.subr.bf16.mxu1 %v862_v41  ;;  %v899_v40 = vunpack.c.l.s8.bf16 %v359_v38  ;;  %v901_v41 = vunpack.c.l.s8.bf16 %v361_v39 }
 0x216   :  { %1466 = vmatpush1.bf16.msra.mxu0 %v859_v44  ;;  %1896 = vmatpush1.bf16.msra.mxu1 %v861_v45  ;;  %v364_v44 = vld [vmem:[#allocation5 + $0x708] sm:$0xff]  ;;  %v366_v45 = vld [vmem:[#allocation5 + $0x718] sm:$0xff] }
 0x217   :  { %1467 = vmatprep.subr.bf16.mxu0 %v864_v46  ;;  %1897 = vmatprep.subr.bf16.mxu1 %v866_v47  ;;  %v903_v46 = vunpack.c.h.s8.bf16 %v359_v38  ;;  %v905_v47 = vunpack.c.h.s8.bf16 %v361_v39  ;;  %v908_v48 = vunpack.c.l.s8.bf16 %v364_v44  ;;  %v910_v49 = vunpack.c.l.s8.bf16 %v366_v45 }
 0x218   :  { %v912_v55 = vunpack.c.h.s8.bf16 %v364_v44 }
 0x21a   :  { %1468 = vmatpush1.bf16.msra.mxu0 %v863_v50  ;;  %1898 = vmatpush1.bf16.msra.mxu1 %v865_v51  ;;  %v363_v50 = vld [vmem:[#allocation5 + $0x700] sm:$0xff]  ;;  %v365_v51 = vld [vmem:[#allocation5 + $0x710] sm:$0xff] }
 0x21b   :  { %1469 = vmatprep.subr.bf16.mxu0 %v868_v52  ;;  %1899 = vmatprep.subr.bf16.mxu1 %v870_v53  ;;  %v2727_v52 = vld [vmem:[#allocation3 + $0x30] ss:$80 sps:$4 sm:$0xff]   ;;  %v907_v53 = vunpack.c.l.s8.bf16 %v363_v50  ;;  %v909_v54 = vunpack.c.l.s8.bf16 %v365_v51  ;;  %v911_v60 = vunpack.c.h.s8.bf16 %v363_v50  ;;  %v913_v61 = vunpack.c.h.s8.bf16 %v365_v51 }
 0x21e   :  { %1470 = vmatpush1.bf16.msra.mxu0 %v867_v56  ;;  %1900 = vmatpush1.bf16.msra.mxu1 %v869_v57  ;;  %v914_v56 = vunpack.c.h.s8.bf16 %v366_v45  ;;  %v368_v57 = vld [vmem:[#allocation5 + $0x728] sm:$0xff] }
 0x21f   :  { %1471 = vmatprep.subr.bf16.mxu0 %v872_v58  ;;  %1901 = vmatprep.subr.bf16.mxu1 %v874_v59  ;;  %v370_v58 = vld [vmem:[#allocation5 + $0x738] sm:$0xff] }
 0x220   :  { %v2732_v59 = vld [vmem:[#allocation3 + $0x3c] ss:$80 sps:$4 sm:$0xff]  }
 0x222   :  { %1472 = vmatpush1.bf16.msra.mxu0 %v871_v62  ;;  %1902 = vmatpush1.bf16.msra.mxu1 %v873_v63  ;;  %v916_v62 = vunpack.c.l.s8.bf16 %v368_v57  ;;  %v918_v63 = vunpack.c.l.s8.bf16 %v370_v58 }
 0x223   :  { %1473 = vmatprep.subr.bf16.mxu0 %v876_v0  ;;  %1903 = vmatprep.subr.bf16.mxu1 %v878_v1  ;;  %v367_v0 = vld [vmem:[#allocation5 + $0x720] sm:$0xff]  ;;  %v369_v1 = vld [vmem:[#allocation5 + $0x730] sm:$0xff] }
 0x224   :  { %v915_v2 = vunpack.c.l.s8.bf16 %v367_v0  ;;  %v917_v3 = vunpack.c.l.s8.bf16 %v369_v1  ;;  %v919_v8 = vunpack.c.h.s8.bf16 %v367_v0  ;;  %v921_v9 = vunpack.c.h.s8.bf16 %v369_v1 }
 0x226   :  { %1474 = vmatpush1.bf16.msra.mxu0 %v875_v4  ;;  %1904 = vmatpush1.bf16.msra.mxu1 %v877_v5  ;;  %v920_v4 = vunpack.c.h.s8.bf16 %v368_v57  ;;  %v922_v5 = vunpack.c.h.s8.bf16 %v370_v58 }
 0x227   :  { %1475 = vmatprep.subr.bf16.mxu0 %v880_v6  ;;  %1905 = vmatprep.subr.bf16.mxu1 %v882_v7  ;;  %v372_v6 = vld [vmem:[#allocation5 + $0x748] sm:$0xff]  ;;  %v374_v7 = vld [vmem:[#allocation5 + $0x758] sm:$0xff] }
 0x22a   :  { %1476 = vmatpush1.bf16.msra.mxu0 %v879_v10  ;;  %1906 = vmatpush1.bf16.msra.mxu1 %v881_v11  ;;  %v924_v10 = vunpack.c.l.s8.bf16 %v372_v6  ;;  %v926_v11 = vunpack.c.l.s8.bf16 %v374_v7 }
 0x22b   :  { %1477 = vmatprep.subr.bf16.mxu0 %v884_v12  ;;  %1907 = vmatprep.subr.bf16.mxu1 %v886_v13  ;;  %v371_v12 = vld [vmem:[#allocation5 + $0x740] sm:$0xff]  ;;  %v373_v13 = vld [vmem:[#allocation5 + $0x750] sm:$0xff] }
 0x22c   :  { %v923_v14 = vunpack.c.l.s8.bf16 %v371_v12  ;;  %v925_v15 = vunpack.c.l.s8.bf16 %v373_v13  ;;  %v927_v20 = vunpack.c.h.s8.bf16 %v371_v12  ;;  %v929_v21 = vunpack.c.h.s8.bf16 %v373_v13 }
 0x22e   :  { %1478 = vmatpush1.bf16.msra.mxu0 %v883_v16  ;;  %1908 = vmatpush1.bf16.msra.mxu1 %v885_v17  ;;  %v928_v16 = vunpack.c.h.s8.bf16 %v372_v6  ;;  %v930_v17 = vunpack.c.h.s8.bf16 %v374_v7 }
 0x22f   :  { %1479 = vmatprep.subr.bf16.mxu0 %v888_v18  ;;  %1909 = vmatprep.subr.bf16.mxu1 %v890_v19  ;;  %v376_v18 = vld [vmem:[#allocation5 + $0x768] sm:$0xff]  ;;  %v378_v19 = vld [vmem:[#allocation5 + $0x778] sm:$0xff] }
 0x232   :  { %1480 = vmatpush1.bf16.msra.mxu0 %v887_v22  ;;  %1910 = vmatpush1.bf16.msra.mxu1 %v889_v23  ;;  %v932_v22 = vunpack.c.l.s8.bf16 %v376_v18  ;;  %v934_v23 = vunpack.c.l.s8.bf16 %v378_v19 }
 0x233   :  { %1481 = vmatprep.subr.bf16.mxu0 %v892_v24  ;;  %1911 = vmatprep.subr.bf16.mxu1 %v894_v25  ;;  %v375_v24 = vld [vmem:[#allocation5 + $0x760] sm:$0xff]  ;;  %v377_v25 = vld [vmem:[#allocation5 + $0x770] sm:$0xff] }
 0x234   :  { %v931_v26 = vunpack.c.l.s8.bf16 %v375_v24  ;;  %v933_v27 = vunpack.c.l.s8.bf16 %v377_v25  ;;  %v935_v32 = vunpack.c.h.s8.bf16 %v375_v24  ;;  %v937_v33 = vunpack.c.h.s8.bf16 %v377_v25 }
 0x236   :  { %1482 = vmatpush1.bf16.msra.mxu0 %v891_v28  ;;  %1912 = vmatpush1.bf16.msra.mxu1 %v893_v29  ;;  %v936_v28 = vunpack.c.h.s8.bf16 %v376_v18  ;;  %v938_v29 = vunpack.c.h.s8.bf16 %v378_v19 }
 0x237   :  { %1483 = vmatprep.subr.bf16.mxu0 %v896_v30  ;;  %1913 = vmatprep.subr.bf16.mxu1 %v898_v31  ;;  %v380_v30 = vld [vmem:[#allocation5 + $0x788] sm:$0xff]  ;;  %v382_v31 = vld [vmem:[#allocation5 + $0x798] sm:$0xff] }
 0x23a   :  { %1484 = vmatpush1.bf16.msra.mxu0 %v895_v34  ;;  %1914 = vmatpush1.bf16.msra.mxu1 %v897_v35  ;;  %v940_v34 = vunpack.c.l.s8.bf16 %v380_v30  ;;  %v942_v35 = vunpack.c.l.s8.bf16 %v382_v31 }
 0x23b   :  { %1485 = vmatprep.subr.bf16.mxu0 %v900_v36  ;;  %1915 = vmatprep.subr.bf16.mxu1 %v902_v37  ;;  %v379_v36 = vld [vmem:[#allocation5 + $0x780] sm:$0xff]  ;;  %v381_v37 = vld [vmem:[#allocation5 + $0x790] sm:$0xff] }
 0x23c   :  { %v939_v38 = vunpack.c.l.s8.bf16 %v379_v36  ;;  %v941_v39 = vunpack.c.l.s8.bf16 %v381_v37  ;;  %v943_v44 = vunpack.c.h.s8.bf16 %v379_v36  ;;  %v945_v45 = vunpack.c.h.s8.bf16 %v381_v37 }
 0x23e   :  { %1486 = vmatpush1.bf16.msra.mxu0 %v899_v40  ;;  %1916 = vmatpush1.bf16.msra.mxu1 %v901_v41  ;;  %v944_v40 = vunpack.c.h.s8.bf16 %v380_v30  ;;  %v946_v41 = vunpack.c.h.s8.bf16 %v382_v31 }
 0x23f   :  { %1487 = vmatprep.subr.bf16.mxu0 %v904_v42  ;;  %1917 = vmatprep.subr.bf16.mxu1 %v906_v43  ;;  %v384_v42 = vld [vmem:[#allocation5 + $0x7a8] sm:$0xff]  ;;  %v386_v43 = vld [vmem:[#allocation5 + $0x7b8] sm:$0xff] }
 0x242   :  { %1488 = vmatpush1.bf16.msra.mxu0 %v903_v46  ;;  %1918 = vmatpush1.bf16.msra.mxu1 %v905_v47  ;;  %v948_v46 = vunpack.c.l.s8.bf16 %v384_v42  ;;  %v950_v47 = vunpack.c.l.s8.bf16 %v386_v43 }
 0x243   :  { %1500 = vmatprep.subr.bf16.mxu0 %v908_v48  ;;  %1930 = vmatprep.subr.bf16.mxu1 %v910_v49  ;;  %v383_v48 = vld [vmem:[#allocation5 + $0x7a0] sm:$0xff]  ;;  %v385_v49 = vld [vmem:[#allocation5 + $0x7b0] sm:$0xff] }
 0x244   :  { %v947_v50 = vunpack.c.l.s8.bf16 %v383_v48  ;;  %v949_v51 = vunpack.c.l.s8.bf16 %v385_v49  ;;  %v953_v57 = vunpack.c.h.s8.bf16 %v385_v49 }
 0x245   :  { %1490 = vmatmul.mubr.bf16.vlgmr.msra.gmra.mrb[0].mxu0 %v2727_v52  ;;  %1920 = vmatmul.mubr.bf16.vlgmr.msra.gmra.mrb[0].mxu1 %v2727_v52  ;;  %v952_v52 = vunpack.c.h.s8.bf16 %v384_v42 }
 0x246   :  { %1501 = vmatpush1.bf16.msra.mxu0 %v907_v53  ;;  %1931 = vmatpush1.bf16.msra.mxu1 %v909_v54  ;;  %v954_v53 = vunpack.c.h.s8.bf16 %v386_v43  ;;  %v388_v54 = vld [vmem:[#allocation5 + $0x7c8] sm:$0xff] }
 0x247   :  { %1502 = vmatprep.subr.bf16.mxu0 %v912_v55  ;;  %1932 = vmatprep.subr.bf16.mxu1 %v914_v56  ;;  %v390_v55 = vld [vmem:[#allocation5 + $0x7d8] sm:$0xff]  ;;  %v951_v56 = vunpack.c.h.s8.bf16 %v383_v48  ;;  %v956_v58 = vunpack.c.l.s8.bf16 %v388_v54  ;;  %v960_v0 = vunpack.c.h.s8.bf16 %v388_v54 }
 0x248   :  { %1532 = vmatprep.mubr.bf16.mxu0 %v2732_v59  ;;  %1962 = vmatprep.mubr.bf16.mxu1 %v2732_v59  ;;  %v958_v59 = vunpack.c.l.s8.bf16 %v390_v55  ;;  %v962_v1 = vunpack.c.h.s8.bf16 %v390_v55 }
 0x24a   :  { %1503 = vmatpush1.bf16.msra.mxu0 %v911_v60  ;;  %1933 = vmatpush1.bf16.msra.mxu1 %v913_v61  ;;  %v387_v60 = vld [vmem:[#allocation5 + $0x7c0] sm:$0xff]  ;;  %v389_v61 = vld [vmem:[#allocation5 + $0x7d0] sm:$0xff] }
 0x24b   :  { %1504 = vmatprep.subr.bf16.mxu0 %v916_v62  ;;  %1934 = vmatprep.subr.bf16.mxu1 %v918_v63  ;;  %v955_v62 = vunpack.c.l.s8.bf16 %v387_v60  ;;  %v957_v63 = vunpack.c.l.s8.bf16 %v389_v61 }
 0x24e   :  { %1505 = vmatpush1.bf16.msra.mxu0 %v915_v2  ;;  %1935 = vmatpush1.bf16.msra.mxu1 %v917_v3  ;;  %v392_v2 = vld [vmem:[#allocation5 + $0x7e8] sm:$0xff]  ;;  %v394_v3 = vld [vmem:[#allocation5 + $0x7f8] sm:$0xff] }
 0x24f   :  { %1506 = vmatprep.subr.bf16.mxu0 %v920_v4  ;;  %1936 = vmatprep.subr.bf16.mxu1 %v922_v5  ;;  %v959_v4 = vunpack.c.h.s8.bf16 %v387_v60  ;;  %v961_v5 = vunpack.c.h.s8.bf16 %v389_v61  ;;  %v964_v6 = vunpack.c.l.s8.bf16 %v392_v2  ;;  %v966_v7 = vunpack.c.l.s8.bf16 %v394_v3 }
 0x250   :  { %v968_v12 = vunpack.c.h.s8.bf16 %v392_v2  ;;  %v970_v13 = vunpack.c.h.s8.bf16 %v394_v3 }
 0x252   :  { %1507 = vmatpush1.bf16.msra.mxu0 %v919_v8  ;;  %1937 = vmatpush1.bf16.msra.mxu1 %v921_v9  ;;  %v391_v8 = vld [vmem:[#allocation5 + $0x7e0] sm:$0xff]  ;;  %v393_v9 = vld [vmem:[#allocation5 + $0x7f0] sm:$0xff] }
 0x253   :  { %1508 = vmatprep.subr.bf16.mxu0 %v924_v10  ;;  %1938 = vmatprep.subr.bf16.mxu1 %v926_v11  ;;  %v963_v10 = vunpack.c.l.s8.bf16 %v391_v8  ;;  %v965_v11 = vunpack.c.l.s8.bf16 %v393_v9 }
 0x256   :  { %1509 = vmatpush1.bf16.msra.mxu0 %v923_v14  ;;  %1939 = vmatpush1.bf16.msra.mxu1 %v925_v15  ;;  %v396_v14 = vld [vmem:[#allocation5 + $0x808] sm:$0xff]  ;;  %v398_v15 = vld [vmem:[#allocation5 + $0x818] sm:$0xff] }
 0x257   :  { %1510 = vmatprep.subr.bf16.mxu0 %v928_v16  ;;  %1940 = vmatprep.subr.bf16.mxu1 %v930_v17  ;;  %v967_v16 = vunpack.c.h.s8.bf16 %v391_v8  ;;  %v969_v17 = vunpack.c.h.s8.bf16 %v393_v9  ;;  %v972_v18 = vunpack.c.l.s8.bf16 %v396_v14  ;;  %v974_v19 = vunpack.c.l.s8.bf16 %v398_v15 }
 0x258   :  { %v976_v25 = vunpack.c.h.s8.bf16 %v396_v14 }
 0x25a   :  { %1511 = vmatpush1.bf16.msra.mxu0 %v927_v20  ;;  %1941 = vmatpush1.bf16.msra.mxu1 %v929_v21  ;;  %v395_v20 = vld [vmem:[#allocation5 + $0x800] sm:$0xff]  ;;  %v397_v21 = vld [vmem:[#allocation5 + $0x810] sm:$0xff] }
 0x25b   :  { %1512 = vmatprep.subr.bf16.mxu0 %v932_v22  ;;  %1942 = vmatprep.subr.bf16.mxu1 %v934_v23  ;;  %v2730_v22 = vld [vmem:[#allocation3 + $0x38] ss:$80 sps:$4 sm:$0xff]   ;;  %v971_v23 = vunpack.c.l.s8.bf16 %v395_v20  ;;  %v973_v24 = vunpack.c.l.s8.bf16 %v397_v21  ;;  %v975_v30 = vunpack.c.h.s8.bf16 %v395_v20  ;;  %v977_v31 = vunpack.c.h.s8.bf16 %v397_v21 }
 0x25e   :  { %1513 = vmatpush1.bf16.msra.mxu0 %v931_v26  ;;  %1943 = vmatpush1.bf16.msra.mxu1 %v933_v27  ;;  %v978_v26 = vunpack.c.h.s8.bf16 %v398_v15  ;;  %v400_v27 = vld [vmem:[#allocation5 + $0x828] sm:$0xff] }
 0x25f   :  { %1514 = vmatprep.subr.bf16.mxu0 %v936_v28  ;;  %1944 = vmatprep.subr.bf16.mxu1 %v938_v29  ;;  %v402_v28 = vld [vmem:[#allocation5 + $0x838] sm:$0xff]  ;;  %v2735_v29 = vld [vmem:[#allocation3 + $0x44] ss:$80 sps:$4 sm:$0xff]  }
 0x262   :  { %1515 = vmatpush1.bf16.msra.mxu0 %v935_v32  ;;  %1945 = vmatpush1.bf16.msra.mxu1 %v937_v33  ;;  %v980_v32 = vunpack.c.l.s8.bf16 %v400_v27  ;;  %v982_v33 = vunpack.c.l.s8.bf16 %v402_v28 }
 0x263   :  { %1516 = vmatprep.subr.bf16.mxu0 %v940_v34  ;;  %1946 = vmatprep.subr.bf16.mxu1 %v942_v35  ;;  %v399_v34 = vld [vmem:[#allocation5 + $0x820] sm:$0xff]  ;;  %v401_v35 = vld [vmem:[#allocation5 + $0x830] sm:$0xff] }
 0x264   :  { %v979_v36 = vunpack.c.l.s8.bf16 %v399_v34  ;;  %v981_v37 = vunpack.c.l.s8.bf16 %v401_v35  ;;  %v983_v42 = vunpack.c.h.s8.bf16 %v399_v34  ;;  %v985_v43 = vunpack.c.h.s8.bf16 %v401_v35 }
 0x266   :  { %1517 = vmatpush1.bf16.msra.mxu0 %v939_v38  ;;  %1947 = vmatpush1.bf16.msra.mxu1 %v941_v39  ;;  %v984_v38 = vunpack.c.h.s8.bf16 %v400_v27  ;;  %v986_v39 = vunpack.c.h.s8.bf16 %v402_v28 }
 0x267   :  { %1518 = vmatprep.subr.bf16.mxu0 %v944_v40  ;;  %1948 = vmatprep.subr.bf16.mxu1 %v946_v41  ;;  %v404_v40 = vld [vmem:[#allocation5 + $0x848] sm:$0xff]  ;;  %v406_v41 = vld [vmem:[#allocation5 + $0x858] sm:$0xff] }
 0x26a   :  { %1519 = vmatpush1.bf16.msra.mxu0 %v943_v44  ;;  %1949 = vmatpush1.bf16.msra.mxu1 %v945_v45  ;;  %v988_v44 = vunpack.c.l.s8.bf16 %v404_v40  ;;  %v990_v45 = vunpack.c.l.s8.bf16 %v406_v41 }
 0x26b   :  { %1520 = vmatprep.subr.bf16.mxu0 %v948_v46  ;;  %1950 = vmatprep.subr.bf16.mxu1 %v950_v47  ;;  %v403_v46 = vld [vmem:[#allocation5 + $0x840] sm:$0xff]  ;;  %v405_v47 = vld [vmem:[#allocation5 + $0x850] sm:$0xff] }
 0x26c   :  { %v987_v48 = vunpack.c.l.s8.bf16 %v403_v46  ;;  %v989_v49 = vunpack.c.l.s8.bf16 %v405_v47  ;;  %v991_v54 = vunpack.c.h.s8.bf16 %v403_v46  ;;  %v993_v55 = vunpack.c.h.s8.bf16 %v405_v47 }
 0x26e   :  { %1521 = vmatpush1.bf16.msra.mxu0 %v947_v50  ;;  %1951 = vmatpush1.bf16.msra.mxu1 %v949_v51  ;;  %v992_v50 = vunpack.c.h.s8.bf16 %v404_v40  ;;  %v994_v51 = vunpack.c.h.s8.bf16 %v406_v41 }
 0x26f   :  { %1522 = vmatprep.subr.bf16.mxu0 %v952_v52  ;;  %1952 = vmatprep.subr.bf16.mxu1 %v954_v53  ;;  %v408_v52 = vld [vmem:[#allocation5 + $0x868] sm:$0xff]  ;;  %v410_v53 = vld [vmem:[#allocation5 + $0x878] sm:$0xff] }
 0x272   :  { %1523 = vmatpush1.bf16.msra.mxu0 %v951_v56  ;;  %1953 = vmatpush1.bf16.msra.mxu1 %v953_v57  ;;  %v996_v56 = vunpack.c.l.s8.bf16 %v408_v52  ;;  %v998_v57 = vunpack.c.l.s8.bf16 %v410_v53 }
 0x273   :  { %1524 = vmatprep.subr.bf16.mxu0 %v956_v58  ;;  %1954 = vmatprep.subr.bf16.mxu1 %v958_v59  ;;  %v407_v58 = vld [vmem:[#allocation5 + $0x860] sm:$0xff]  ;;  %v409_v59 = vld [vmem:[#allocation5 + $0x870] sm:$0xff] }
 0x274   :  { %v995_v60 = vunpack.c.l.s8.bf16 %v407_v58  ;;  %v997_v61 = vunpack.c.l.s8.bf16 %v409_v59  ;;  %v999_v2 = vunpack.c.h.s8.bf16 %v407_v58  ;;  %v1001_v3 = vunpack.c.h.s8.bf16 %v409_v59 }
 0x276   :  { %1525 = vmatpush1.bf16.msra.mxu0 %v955_v62  ;;  %1955 = vmatpush1.bf16.msra.mxu1 %v957_v63  ;;  %v1000_v62 = vunpack.c.h.s8.bf16 %v408_v52  ;;  %v1002_v63 = vunpack.c.h.s8.bf16 %v410_v53 }
 0x277   :  { %1526 = vmatprep.subr.bf16.mxu0 %v960_v0  ;;  %1956 = vmatprep.subr.bf16.mxu1 %v962_v1  ;;  %v412_v0 = vld [vmem:[#allocation5 + $0x888] sm:$0xff]  ;;  %v414_v1 = vld [vmem:[#allocation5 + $0x898] sm:$0xff] }
 0x27a   :  { %1527 = vmatpush1.bf16.msra.mxu0 %v959_v4  ;;  %1957 = vmatpush1.bf16.msra.mxu1 %v961_v5  ;;  %v1004_v4 = vunpack.c.l.s8.bf16 %v412_v0  ;;  %v1006_v5 = vunpack.c.l.s8.bf16 %v414_v1 }
 0x27b   :  { %1528 = vmatprep.subr.bf16.mxu0 %v964_v6  ;;  %1958 = vmatprep.subr.bf16.mxu1 %v966_v7  ;;  %v411_v6 = vld [vmem:[#allocation5 + $0x880] sm:$0xff]  ;;  %v413_v7 = vld [vmem:[#allocation5 + $0x890] sm:$0xff] }
 0x27c   :  { %v1003_v8 = vunpack.c.l.s8.bf16 %v411_v6  ;;  %v1005_v9 = vunpack.c.l.s8.bf16 %v413_v7  ;;  %v1007_v14 = vunpack.c.h.s8.bf16 %v411_v6  ;;  %v1009_v15 = vunpack.c.h.s8.bf16 %v413_v7 }
 0x27e   :  { %1529 = vmatpush1.bf16.msra.mxu0 %v963_v10  ;;  %1959 = vmatpush1.bf16.msra.mxu1 %v965_v11  ;;  %v1008_v10 = vunpack.c.h.s8.bf16 %v412_v0  ;;  %v1010_v11 = vunpack.c.h.s8.bf16 %v414_v1 }
 0x27f   :  { %1530 = vmatprep.subr.bf16.mxu0 %v968_v12  ;;  %1960 = vmatprep.subr.bf16.mxu1 %v970_v13  ;;  %v416_v12 = vld [vmem:[#allocation5 + $0x8a8] sm:$0xff]  ;;  %v418_v13 = vld [vmem:[#allocation5 + $0x8b8] sm:$0xff] }
 0x282   :  { %1531 = vmatpush1.bf16.msra.mxu0 %v967_v16  ;;  %1961 = vmatpush1.bf16.msra.mxu1 %v969_v17  ;;  %v1012_v16 = vunpack.c.l.s8.bf16 %v416_v12  ;;  %v1014_v17 = vunpack.c.l.s8.bf16 %v418_v13 }
 0x283   :  { %1543 = vmatprep.subr.bf16.mxu0 %v972_v18  ;;  %1973 = vmatprep.subr.bf16.mxu1 %v974_v19  ;;  %v415_v18 = vld [vmem:[#allocation5 + $0x8a0] sm:$0xff]  ;;  %v417_v19 = vld [vmem:[#allocation5 + $0x8b0] sm:$0xff] }
 0x284   :  { %v1011_v20 = vunpack.c.l.s8.bf16 %v415_v18  ;;  %v1013_v21 = vunpack.c.l.s8.bf16 %v417_v19  ;;  %v1017_v27 = vunpack.c.h.s8.bf16 %v417_v19 }
 0x285   :  { %1533 = vmatmul.mubr.bf16.vlgmr.msra.gmra.mrb[0].mxu0 %v2730_v22  ;;  %1963 = vmatmul.mubr.bf16.vlgmr.msra.gmra.mrb[0].mxu1 %v2730_v22  ;;  %v1016_v22 = vunpack.c.h.s8.bf16 %v416_v12 }
 0x286   :  { %1544 = vmatpush1.bf16.msra.mxu0 %v971_v23  ;;  %1974 = vmatpush1.bf16.msra.mxu1 %v973_v24  ;;  %v1018_v23 = vunpack.c.h.s8.bf16 %v418_v13  ;;  %v420_v24 = vld [vmem:[#allocation5 + $0x8c8] sm:$0xff] }
 0x287   :  { %1545 = vmatprep.subr.bf16.mxu0 %v976_v25  ;;  %1975 = vmatprep.subr.bf16.mxu1 %v978_v26  ;;  %v422_v25 = vld [vmem:[#allocation5 + $0x8d8] sm:$0xff]  ;;  %v1015_v26 = vunpack.c.h.s8.bf16 %v415_v18  ;;  %v1020_v28 = vunpack.c.l.s8.bf16 %v420_v24  ;;  %v1024_v34 = vunpack.c.h.s8.bf16 %v420_v24 }
 0x288   :  { %1575 = vmatprep.mubr.bf16.mxu0 %v2735_v29  ;;  %2005 = vmatprep.mubr.bf16.mxu1 %v2735_v29  ;;  %v1022_v29 = vunpack.c.l.s8.bf16 %v422_v25  ;;  %v1026_v35 = vunpack.c.h.s8.bf16 %v422_v25 }
 0x28a   :  { %1546 = vmatpush1.bf16.msra.mxu0 %v975_v30  ;;  %1976 = vmatpush1.bf16.msra.mxu1 %v977_v31  ;;  %v419_v30 = vld [vmem:[#allocation5 + $0x8c0] sm:$0xff]  ;;  %v421_v31 = vld [vmem:[#allocation5 + $0x8d0] sm:$0xff] }
 0x28b   :  { %1547 = vmatprep.subr.bf16.mxu0 %v980_v32  ;;  %1977 = vmatprep.subr.bf16.mxu1 %v982_v33  ;;  %v1019_v32 = vunpack.c.l.s8.bf16 %v419_v30  ;;  %v1021_v33 = vunpack.c.l.s8.bf16 %v421_v31 }
 0x28e   :  { %1548 = vmatpush1.bf16.msra.mxu0 %v979_v36  ;;  %1978 = vmatpush1.bf16.msra.mxu1 %v981_v37  ;;  %v424_v36 = vld [vmem:[#allocation5 + $0x8e8] sm:$0xff]  ;;  %v426_v37 = vld [vmem:[#allocation5 + $0x8f8] sm:$0xff] }
 0x28f   :  { %1549 = vmatprep.subr.bf16.mxu0 %v984_v38  ;;  %1979 = vmatprep.subr.bf16.mxu1 %v986_v39  ;;  %v1023_v38 = vunpack.c.h.s8.bf16 %v419_v30  ;;  %v1025_v39 = vunpack.c.h.s8.bf16 %v421_v31  ;;  %v1028_v40 = vunpack.c.l.s8.bf16 %v424_v36  ;;  %v1030_v41 = vunpack.c.l.s8.bf16 %v426_v37 }
 0x290   :  { %v1032_v46 = vunpack.c.h.s8.bf16 %v424_v36  ;;  %v1034_v47 = vunpack.c.h.s8.bf16 %v426_v37 }
 0x292   :  { %1550 = vmatpush1.bf16.msra.mxu0 %v983_v42  ;;  %1980 = vmatpush1.bf16.msra.mxu1 %v985_v43  ;;  %v423_v42 = vld [vmem:[#allocation5 + $0x8e0] sm:$0xff]  ;;  %v425_v43 = vld [vmem:[#allocation5 + $0x8f0] sm:$0xff] }
 0x293   :  { %1551 = vmatprep.subr.bf16.mxu0 %v988_v44  ;;  %1981 = vmatprep.subr.bf16.mxu1 %v990_v45  ;;  %v1027_v44 = vunpack.c.l.s8.bf16 %v423_v42  ;;  %v1029_v45 = vunpack.c.l.s8.bf16 %v425_v43 }
 0x296   :  { %1552 = vmatpush1.bf16.msra.mxu0 %v987_v48  ;;  %1982 = vmatpush1.bf16.msra.mxu1 %v989_v49  ;;  %v428_v48 = vld [vmem:[#allocation5 + $0x908] sm:$0xff]  ;;  %v430_v49 = vld [vmem:[#allocation5 + $0x918] sm:$0xff] }
 0x297   :  { %1553 = vmatprep.subr.bf16.mxu0 %v992_v50  ;;  %1983 = vmatprep.subr.bf16.mxu1 %v994_v51  ;;  %v1031_v50 = vunpack.c.h.s8.bf16 %v423_v42  ;;  %v1033_v51 = vunpack.c.h.s8.bf16 %v425_v43  ;;  %v1036_v52 = vunpack.c.l.s8.bf16 %v428_v48  ;;  %v1038_v53 = vunpack.c.l.s8.bf16 %v430_v49 }
 0x298   :  { %v1040_v59 = vunpack.c.h.s8.bf16 %v428_v48 }
 0x29a   :  { %1554 = vmatpush1.bf16.msra.mxu0 %v991_v54  ;;  %1984 = vmatpush1.bf16.msra.mxu1 %v993_v55  ;;  %v427_v54 = vld [vmem:[#allocation5 + $0x900] sm:$0xff]  ;;  %v429_v55 = vld [vmem:[#allocation5 + $0x910] sm:$0xff] }
 0x29b   :  { %1555 = vmatprep.subr.bf16.mxu0 %v996_v56  ;;  %1985 = vmatprep.subr.bf16.mxu1 %v998_v57  ;;  %v2733_v56 = vld [vmem:[#allocation3 + $0x40] ss:$80 sps:$4 sm:$0xff]   ;;  %v1035_v57 = vunpack.c.l.s8.bf16 %v427_v54  ;;  %v1037_v58 = vunpack.c.l.s8.bf16 %v429_v55  ;;  %v1039_v0 = vunpack.c.h.s8.bf16 %v427_v54  ;;  %v1041_v1 = vunpack.c.h.s8.bf16 %v429_v55 }
 0x29e   :  { %1556 = vmatpush1.bf16.msra.mxu0 %v995_v60  ;;  %1986 = vmatpush1.bf16.msra.mxu1 %v997_v61  ;;  %v1042_v60 = vunpack.c.h.s8.bf16 %v430_v49  ;;  %v432_v61 = vld [vmem:[#allocation5 + $0x928] sm:$0xff] }
 0x29f   :  { %1557 = vmatprep.subr.bf16.mxu0 %v1000_v62  ;;  %1987 = vmatprep.subr.bf16.mxu1 %v1002_v63  ;;  %v434_v62 = vld [vmem:[#allocation5 + $0x938] sm:$0xff] }
 0x2a0   :  { %v2738_v63 = vld [vmem:[#allocation3 + $0x4c] ss:$80 sps:$4 sm:$0xff]  }
 0x2a2   :  { %1558 = vmatpush1.bf16.msra.mxu0 %v999_v2  ;;  %1988 = vmatpush1.bf16.msra.mxu1 %v1001_v3  ;;  %v1044_v2 = vunpack.c.l.s8.bf16 %v432_v61  ;;  %v1046_v3 = vunpack.c.l.s8.bf16 %v434_v62 }
 0x2a3   :  { %1559 = vmatprep.subr.bf16.mxu0 %v1004_v4  ;;  %1989 = vmatprep.subr.bf16.mxu1 %v1006_v5  ;;  %v431_v4 = vld [vmem:[#allocation5 + $0x920] sm:$0xff]  ;;  %v433_v5 = vld [vmem:[#allocation5 + $0x930] sm:$0xff] }
 0x2a4   :  { %v1043_v6 = vunpack.c.l.s8.bf16 %v431_v4  ;;  %v1045_v7 = vunpack.c.l.s8.bf16 %v433_v5  ;;  %v1047_v12 = vunpack.c.h.s8.bf16 %v431_v4  ;;  %v1049_v13 = vunpack.c.h.s8.bf16 %v433_v5 }
 0x2a6   :  { %1560 = vmatpush1.bf16.msra.mxu0 %v1003_v8  ;;  %1990 = vmatpush1.bf16.msra.mxu1 %v1005_v9  ;;  %v1048_v8 = vunpack.c.h.s8.bf16 %v432_v61  ;;  %v1050_v9 = vunpack.c.h.s8.bf16 %v434_v62 }
 0x2a7   :  { %1561 = vmatprep.subr.bf16.mxu0 %v1008_v10  ;;  %1991 = vmatprep.subr.bf16.mxu1 %v1010_v11  ;;  %v436_v10 = vld [vmem:[#allocation5 + $0x948] sm:$0xff]  ;;  %v438_v11 = vld [vmem:[#allocation5 + $0x958] sm:$0xff] }
 0x2aa   :  { %1562 = vmatpush1.bf16.msra.mxu0 %v1007_v14  ;;  %1992 = vmatpush1.bf16.msra.mxu1 %v1009_v15  ;;  %v1052_v14 = vunpack.c.l.s8.bf16 %v436_v10  ;;  %v1054_v15 = vunpack.c.l.s8.bf16 %v438_v11 }
 0x2ab   :  { %1563 = vmatprep.subr.bf16.mxu0 %v1012_v16  ;;  %1993 = vmatprep.subr.bf16.mxu1 %v1014_v17  ;;  %v435_v16 = vld [vmem:[#allocation5 + $0x940] sm:$0xff]  ;;  %v437_v17 = vld [vmem:[#allocation5 + $0x950] sm:$0xff] }
 0x2ac   :  { %v1051_v18 = vunpack.c.l.s8.bf16 %v435_v16  ;;  %v1053_v19 = vunpack.c.l.s8.bf16 %v437_v17  ;;  %v1055_v24 = vunpack.c.h.s8.bf16 %v435_v16  ;;  %v1057_v25 = vunpack.c.h.s8.bf16 %v437_v17 }
 0x2ae   :  { %1564 = vmatpush1.bf16.msra.mxu0 %v1011_v20  ;;  %1994 = vmatpush1.bf16.msra.mxu1 %v1013_v21  ;;  %v1056_v20 = vunpack.c.h.s8.bf16 %v436_v10  ;;  %v1058_v21 = vunpack.c.h.s8.bf16 %v438_v11 }
 0x2af   :  { %1565 = vmatprep.subr.bf16.mxu0 %v1016_v22  ;;  %1995 = vmatprep.subr.bf16.mxu1 %v1018_v23  ;;  %v440_v22 = vld [vmem:[#allocation5 + $0x968] sm:$0xff]  ;;  %v442_v23 = vld [vmem:[#allocation5 + $0x978] sm:$0xff] }
 0x2b2   :  { %1566 = vmatpush1.bf16.msra.mxu0 %v1015_v26  ;;  %1996 = vmatpush1.bf16.msra.mxu1 %v1017_v27  ;;  %v1060_v26 = vunpack.c.l.s8.bf16 %v440_v22  ;;  %v1062_v27 = vunpack.c.l.s8.bf16 %v442_v23 }
 0x2b3   :  { %1567 = vmatprep.subr.bf16.mxu0 %v1020_v28  ;;  %1997 = vmatprep.subr.bf16.mxu1 %v1022_v29  ;;  %v439_v28 = vld [vmem:[#allocation5 + $0x960] sm:$0xff]  ;;  %v441_v29 = vld [vmem:[#allocation5 + $0x970] sm:$0xff] }
 0x2b4   :  { %v1059_v30 = vunpack.c.l.s8.bf16 %v439_v28  ;;  %v1061_v31 = vunpack.c.l.s8.bf16 %v441_v29  ;;  %v1063_v36 = vunpack.c.h.s8.bf16 %v439_v28  ;;  %v1065_v37 = vunpack.c.h.s8.bf16 %v441_v29  ;;  %v2746_v28 = vld [vmem:[#allocation10 + $0x88] sm:$0xff]   ;;  %v2747_v29 = vld [vmem:[#allocation10 + $0x50] sm:$0xff]  }
 0x2b6   :  { %1568 = vmatpush1.bf16.msra.mxu0 %v1019_v32  ;;  %1998 = vmatpush1.bf16.msra.mxu1 %v1021_v33  ;;  %v1064_v32 = vunpack.c.h.s8.bf16 %v440_v22  ;;  %v1066_v33 = vunpack.c.h.s8.bf16 %v442_v23  ;;  %v2736_v22 = vld [vmem:[#allocation3 + $0x48] ss:$80 sps:$4 sm:$0xff]  }
 0x2b7   :  { %1569 = vmatprep.subr.bf16.mxu0 %v1024_v34  ;;  %1999 = vmatprep.subr.bf16.mxu1 %v1026_v35  ;;  %v444_v34 = vld [vmem:[#allocation5 + $0x988] sm:$0xff]  ;;  %v446_v35 = vld [vmem:[#allocation5 + $0x998] sm:$0xff] }
 0x2b8   :  { %v2741_v23 = vld [vmem:[#allocation10] sm:$0xff]  }
 0x2ba   :  { %1570 = vmatpush1.bf16.msra.mxu0 %v1023_v38  ;;  %2000 = vmatpush1.bf16.msra.mxu1 %v1025_v39  ;;  %v1068_v38 = vunpack.c.l.s8.bf16 %v444_v34  ;;  %v1070_v39 = vunpack.c.l.s8.bf16 %v446_v35 }
 0x2bb   :  { %1571 = vmatprep.subr.bf16.mxu0 %v1028_v40  ;;  %2001 = vmatprep.subr.bf16.mxu1 %v1030_v41  ;;  %v443_v40 = vld [vmem:[#allocation5 + $0x980] sm:$0xff]  ;;  %v445_v41 = vld [vmem:[#allocation5 + $0x990] sm:$0xff] }
 0x2bc   :  { %v1067_v42 = vunpack.c.l.s8.bf16 %v443_v40  ;;  %v1069_v43 = vunpack.c.l.s8.bf16 %v445_v41  ;;  %v1071_v48 = vunpack.c.h.s8.bf16 %v443_v40  ;;  %v1073_v49 = vunpack.c.h.s8.bf16 %v445_v41  ;;  %v2758_v40 = vld [vmem:[#allocation10 + $0xa0] sm:$0xff]   ;;  %v2759_v41 = vld [vmem:[#allocation10 + $0x68] sm:$0xff]  }
 0x2be   :  { %1572 = vmatpush1.bf16.msra.mxu0 %v1027_v44  ;;  %2002 = vmatpush1.bf16.msra.mxu1 %v1029_v45  ;;  %v1072_v44 = vunpack.c.h.s8.bf16 %v444_v34  ;;  %v1074_v45 = vunpack.c.h.s8.bf16 %v446_v35  ;;  %v2752_v34 = vld [vmem:[#allocation10 + $0xd8] sm:$0xff]  }
 0x2bf   :  { %1573 = vmatprep.subr.bf16.mxu0 %v1032_v46  ;;  %2003 = vmatprep.subr.bf16.mxu1 %v1034_v47  ;;  %v448_v46 = vld [vmem:[#allocation5 + $0x9a8] sm:$0xff]  ;;  %v450_v47 = vld [vmem:[#allocation5 + $0x9b8] sm:$0xff]  ;;  %v2753_v35 = vld [vmem:[#allocation10 + $0x18] sm:$0xff]  }
 0x2c2   :  { %1574 = vmatpush1.bf16.msra.mxu0 %v1031_v50  ;;  %2004 = vmatpush1.bf16.msra.mxu1 %v1033_v51  ;;  %v1076_v50 = vunpack.c.l.s8.bf16 %v448_v46  ;;  %v1078_v51 = vunpack.c.l.s8.bf16 %v450_v47 }
 0x2c3   :  { %1586 = vmatprep.subr.bf16.mxu0 %v1036_v52  ;;  %2016 = vmatprep.subr.bf16.mxu1 %v1038_v53  ;;  %v447_v52 = vld [vmem:[#allocation5 + $0x9a0] sm:$0xff]  ;;  %v449_v53 = vld [vmem:[#allocation5 + $0x9b0] sm:$0xff] }
 0x2c4   :  { %v1075_v54 = vunpack.c.l.s8.bf16 %v447_v52  ;;  %v1077_v55 = vunpack.c.l.s8.bf16 %v449_v53  ;;  %v1081_v61 = vunpack.c.h.s8.bf16 %v449_v53  ;;  %v2061_v53 = vlaneseq }
 0x2c5   :  { %1576 = vmatmul.mubr.bf16.vlgmr.msra.gmra.mrb[0].mxu0 %v2733_v56  ;;  %2006 = vmatmul.mubr.bf16.vlgmr.msra.gmra.mrb[0].mxu1 %v2733_v56  ;;  %v1080_v56 = vunpack.c.h.s8.bf16 %v448_v46  ;;  %v2764_v46 = vld [vmem:[#allocation10 + $0xf0] sm:$0xff]  }
 0x2c6   :  { %1587 = vmatpush1.bf16.msra.mxu0 %v1035_v57  ;;  %2017 = vmatpush1.bf16.msra.mxu1 %v1037_v58  ;;  %v1082_v57 = vunpack.c.h.s8.bf16 %v450_v47  ;;  %v452_v58 = vld [vmem:[#allocation5 + $0x9c8] sm:$0xff]  ;;  %v2765_v47 = vld [vmem:[#allocation10 + $0x30] sm:$0xff]  }
 0x2c7   :  { %1588 = vmatprep.subr.bf16.mxu0 %v1040_v59  ;;  %2018 = vmatprep.subr.bf16.mxu1 %v1042_v60  ;;  %v454_v59 = vld [vmem:[#allocation5 + $0x9d8] sm:$0xff]  ;;  %v1079_v60 = vunpack.c.h.s8.bf16 %v447_v52  ;;  %v1084_v62 = vunpack.c.l.s8.bf16 %v452_v58  ;;  %v1088_v4 = vunpack.c.h.s8.bf16 %v452_v58  ;;  %v2770_v52 = vld [vmem:[#allocation10 + $0xb8] sm:$0xff]  }
 0x2c8   :  { %1618 = vmatprep.mubr.bf16.mxu0 %v2738_v63  ;;  %2048 = vmatprep.mubr.bf16.mxu1 %v2738_v63  ;;  %v1086_v63 = vunpack.c.l.s8.bf16 %v454_v59  ;;  %v1090_v5 = vunpack.c.h.s8.bf16 %v454_v59 }
 0x2ca   :  { %1589 = vmatpush1.bf16.msra.mxu0 %v1039_v0  ;;  %2019 = vmatpush1.bf16.msra.mxu1 %v1041_v1  ;;  %v451_v0 = vld [vmem:[#allocation5 + $0x9c0] sm:$0xff]  ;;  %v453_v1 = vld [vmem:[#allocation5 + $0x9d0] sm:$0xff] }
 0x2cb   :  { %1590 = vmatprep.subr.bf16.mxu0 %v1044_v2  ;;  %2020 = vmatprep.subr.bf16.mxu1 %v1046_v3  ;;  %v1083_v2 = vunpack.c.l.s8.bf16 %v451_v0  ;;  %v1085_v3 = vunpack.c.l.s8.bf16 %v453_v1 }
 0x2ce   :  { %1591 = vmatpush1.bf16.msra.mxu0 %v1043_v6  ;;  %2021 = vmatpush1.bf16.msra.mxu1 %v1045_v7  ;;  %v456_v6 = vld [vmem:[#allocation5 + $0x9e8] sm:$0xff]  ;;  %v458_v7 = vld [vmem:[#allocation5 + $0x9f8] sm:$0xff] }
 0x2cf   :  { %1592 = vmatprep.subr.bf16.mxu0 %v1048_v8  ;;  %2022 = vmatprep.subr.bf16.mxu1 %v1050_v9  ;;  %v1087_v8 = vunpack.c.h.s8.bf16 %v451_v0  ;;  %v1089_v9 = vunpack.c.h.s8.bf16 %v453_v1  ;;  %v1092_v10 = vunpack.c.l.s8.bf16 %v456_v6  ;;  %v1094_v11 = vunpack.c.l.s8.bf16 %v458_v7 }
 0x2d0   :  { %v1096_v16 = vunpack.c.h.s8.bf16 %v456_v6  ;;  %v1098_v17 = vunpack.c.h.s8.bf16 %v458_v7 }
 0x2d2   :  { %1593 = vmatpush1.bf16.msra.mxu0 %v1047_v12  ;;  %2023 = vmatpush1.bf16.msra.mxu1 %v1049_v13  ;;  %v455_v12 = vld [vmem:[#allocation5 + $0x9e0] sm:$0xff]  ;;  %v457_v13 = vld [vmem:[#allocation5 + $0x9f0] sm:$0xff] }
 0x2d3   :  { %1594 = vmatprep.subr.bf16.mxu0 %v1052_v14  ;;  %2024 = vmatprep.subr.bf16.mxu1 %v1054_v15  ;;  %v1091_v14 = vunpack.c.l.s8.bf16 %v455_v12  ;;  %v1093_v15 = vunpack.c.l.s8.bf16 %v457_v13 }
 0x2d6   :  { %1595 = vmatpush1.bf16.msra.mxu0 %v1051_v18  ;;  %2025 = vmatpush1.bf16.msra.mxu1 %v1053_v19  ;;  %v1095_v18 = vunpack.c.h.s8.bf16 %v455_v12  ;;  %v1097_v19 = vunpack.c.h.s8.bf16 %v457_v13 }
 0x2d7   :  { %1596 = vmatprep.subr.bf16.mxu0 %v1056_v20  ;;  %2026 = vmatprep.subr.bf16.mxu1 %v1058_v21  ;;  %v2739_v20 = vld [vmem:[#allocation10 + $0x40] sm:$0xff]  }
 0x2d8   :  { %v2740_v21 = vld [vmem:[#allocation10 + $0xc0] sm:$0xff]  }
 0x2da   :  { %1597 = vmatpush1.bf16.msra.mxu0 %v1055_v24  ;;  %2027 = vmatpush1.bf16.msra.mxu1 %v1057_v25  ;;  %v2742_v24 = vld [vmem:[#allocation10 + $0x80] sm:$0xff]   ;;  %v2743_v25 = vld [vmem:[#allocation10 + $0x48] sm:$0xff]  }
 0x2db   :  { %1598 = vmatprep.subr.bf16.mxu0 %v1060_v26  ;;  %2028 = vmatprep.subr.bf16.mxu1 %v1062_v27  ;;  %v2744_v26 = vld [vmem:[#allocation10 + $0xc8] sm:$0xff]  }
 0x2dc   :  { %v2745_v27 = vld [vmem:[#allocation10 + $0x8] sm:$0xff]  }
 0x2de   :  { %1599 = vmatpush1.bf16.msra.mxu0 %v1059_v30  ;;  %2029 = vmatpush1.bf16.msra.mxu1 %v1061_v31  ;;  %v2748_v30 = vld [vmem:[#allocation10 + $0xd0] sm:$0xff]  }
 0x2df   :  { %1600 = vmatprep.subr.bf16.mxu0 %v1064_v32  ;;  %2030 = vmatprep.subr.bf16.mxu1 %v1066_v33  ;;  %v2749_v31 = vld [vmem:[#allocation10 + $0x10] sm:$0xff]   ;;  %v2751_v33 = vld [vmem:[#allocation10 + $0x58] sm:$0xff]  }
 0x2e0   :  { %v2750_v32 = vld [vmem:[#allocation10 + $0x90] sm:$0xff]  }
 0x2e2   :  { %1601 = vmatpush1.bf16.msra.mxu0 %v1063_v36  ;;  %2031 = vmatpush1.bf16.msra.mxu1 %v1065_v37  ;;  %v2754_v36 = vld [vmem:[#allocation10 + $0x98] sm:$0xff]   ;;  %v2755_v37 = vld [vmem:[#allocation10 + $0x60] sm:$0xff]  }
 0x2e3   :  { %1602 = vmatprep.subr.bf16.mxu0 %v1068_v38  ;;  %2032 = vmatprep.subr.bf16.mxu1 %v1070_v39  ;;  %v2756_v38 = vld [vmem:[#allocation10 + $0xe0] sm:$0xff]  }
 0x2e4   :  { %v2757_v39 = vld [vmem:[#allocation10 + $0x20] sm:$0xff]  }
 0x2e6   :  { %1603 = vmatpush1.bf16.msra.mxu0 %v1067_v42  ;;  %2033 = vmatpush1.bf16.msra.mxu1 %v1069_v43  ;;  %v2760_v42 = vld [vmem:[#allocation10 + $0xe8] sm:$0xff]  }
 0x2e7   :  { %1604 = vmatprep.subr.bf16.mxu0 %v1072_v44  ;;  %2034 = vmatprep.subr.bf16.mxu1 %v1074_v45  ;;  %v2761_v43 = vld [vmem:[#allocation10 + $0x28] sm:$0xff]   ;;  %v2763_v45 = vld [vmem:[#allocation10 + $0x70] sm:$0xff]  }
 0x2e8   :  { %v2762_v44 = vld [vmem:[#allocation10 + $0xa8] sm:$0xff]  }
 0x2ea   :  { %1605 = vmatpush1.bf16.msra.mxu0 %v1071_v48  ;;  %2035 = vmatpush1.bf16.msra.mxu1 %v1073_v49  ;;  %v2766_v48 = vld [vmem:[#allocation10 + $0xb0] sm:$0xff]   ;;  %v2767_v49 = vld [vmem:[#allocation10 + $0x78] sm:$0xff]  }
 0x2eb   :  { %1606 = vmatprep.subr.bf16.mxu0 %v1076_v50  ;;  %2036 = vmatprep.subr.bf16.mxu1 %v1078_v51  ;;  %v2768_v50 = vld [vmem:[#allocation10 + $0xf8] sm:$0xff]  }
 0x2ec   :  { %v2769_v51 = vld [vmem:[#allocation10 + $0x38] sm:$0xff]  }
 0x2ee   :  { %1607 = vmatpush1.bf16.msra.mxu0 %v1075_v54  ;;  %2037 = vmatpush1.bf16.msra.mxu1 %v1077_v55  ;;  %v2062_v54 = vshrl.u32 %v2061_v53, 7 }
 0x2ef   :  { %1608 = vmatprep.subr.bf16.mxu0 %v1080_v56  ;;  %2038 = vmatprep.subr.bf16.mxu1 %v1082_v57  ;;  %v2059_v57 = vld [vmem:[#allocation7] sm:$0xf] }
 0x2f0   :  { %v2063_v55 = vsub.s32 0, %v2062_v54  ;;  %v2071_v56 = vsub.s32 2, %v2062_v54  ;;  %v2067_v58 = vsub.s32 1, %v2062_v54  ;;  %v2075_v59 = vsub.s32 3, %v2062_v54 }
 0x2f2   :  { %1609 = vmatpush1.bf16.msra.mxu0 %v1079_v60  ;;  %2039 = vmatpush1.bf16.msra.mxu1 %v1081_v61  ;;  %v2089_v60 = vld [vmem:[#allocation8] sm:$0xf]  ;;  %v2064_v61 = vrot.slane %v2059_v57, %v2063_v55  ;;  %v2076_v0 = vrot.slane %v2059_v57, %v2075_v59 }
 0x2f3   :  { %1610 = vmatprep.subr.bf16.mxu0 %v1084_v62  ;;  %2040 = vmatprep.subr.bf16.mxu1 %v1086_v63  ;;  %v2072_v62 = vrot.slane %v2059_v57, %v2071_v56  ;;  %v2068_v63 = vrot.slane %v2059_v57, %v2067_v58  ;;  %v2094_v1 = vrot.slane %v2089_v60, %v2063_v55  ;;  %v2576_v57 = vld [vmem:[#allocation13] ss:$0 sm:$0xff] }
 0x2f4   :  { %v2106_v6 = vrot.slane %v2089_v60, %v2075_v59 }
 0x2f6   :  { %1611 = vmatpush1.bf16.msra.mxu0 %v1083_v2  ;;  %2041 = vmatpush1.bf16.msra.mxu1 %v1085_v3  ;;  %v2102_v2 = vrot.slane %v2089_v60, %v2071_v56 }
 0x2f7   :  { %1612 = vmatprep.subr.bf16.mxu0 %v1088_v4  ;;  %2042 = vmatprep.subr.bf16.mxu1 %v1090_v5  ;;  %v2098_v5 = vrot.slane %v2089_v60, %v2067_v58 }
 0x2fa   :  { %1613 = vmatpush1.bf16.msra.mxu0 %v1087_v8  ;;  %2043 = vmatpush1.bf16.msra.mxu1 %v1089_v9 }
 0x2fb   :  { %1614 = vmatprep.subr.bf16.mxu0 %v1092_v10  ;;  %2044 = vmatprep.subr.bf16.mxu1 %v1094_v11 }
 0x2fe   :  { %1615 = vmatpush1.bf16.msra.mxu0 %v1091_v14  ;;  %2045 = vmatpush1.bf16.msra.mxu1 %v1093_v15 }
 0x2ff   :  { %1616 = vmatprep.subr.bf16.mxu0 %v1096_v16  ;;  %2046 = vmatprep.subr.bf16.mxu1 %v1098_v17 }
 0x302   :  { %1617 = vmatpush1.bf16.msra.mxu0 %v1095_v18  ;;  %2047 = vmatpush1.bf16.msra.mxu1 %v1097_v19 }
 0x303   :  { %2580 = vmatprep.subr.bf16.mxu0 %v2739_v20  ;;  %2602 = vmatprep.subr.bf16.mxu1 %v2740_v21 }
 0x305   :  { %1619 = vmatmul.mubr.bf16.vlgmr.msra.gmra.mrb[0].mxu0 %v2736_v22  ;;  %2049 = vmatmul.mubr.bf16.vlgmr.msra.gmra.mrb[0].mxu1 %v2736_v22 }
 0x306   :  { %2581 = vmatpush3.bf16.msra.mxu0 %v2741_v23  ;;  %2603 = vmatpush3.bf16.msra.mxu1 %v2742_v24 }
 0x307   :  { %2582 = vmatprep.subr.bf16.mxu0 %v2743_v25  ;;  %2604 = vmatprep.subr.bf16.mxu1 %v2744_v26 }
 0x30a   :  { %2583 = vmatpush3.bf16.msra.mxu0 %v2745_v27  ;;  %2605 = vmatpush3.bf16.msra.mxu1 %v2746_v28 }
 0x30b   :  { %2584 = vmatprep.subr.bf16.mxu0 %v2747_v29  ;;  %2606 = vmatprep.subr.bf16.mxu1 %v2748_v30 }
 0x30e   :  { %2585 = vmatpush3.bf16.msra.mxu0 %v2749_v31  ;;  %2607 = vmatpush3.bf16.msra.mxu1 %v2750_v32 }
 0x30f   :  { %2586 = vmatprep.subr.bf16.mxu0 %v2751_v33  ;;  %2608 = vmatprep.subr.bf16.mxu1 %v2752_v34 }
 0x312   :  { %2587 = vmatpush3.bf16.msra.mxu0 %v2753_v35  ;;  %2609 = vmatpush3.bf16.msra.mxu1 %v2754_v36 }
 0x313   :  { %2588 = vmatprep.subr.bf16.mxu0 %v2755_v37  ;;  %2610 = vmatprep.subr.bf16.mxu1 %v2756_v38 }
 0x316   :  { %2589 = vmatpush3.bf16.msra.mxu0 %v2757_v39  ;;  %2611 = vmatpush3.bf16.msra.mxu1 %v2758_v40 }
 0x317   :  { %2590 = vmatprep.subr.bf16.mxu0 %v2759_v41  ;;  %2612 = vmatprep.subr.bf16.mxu1 %v2760_v42 }
 0x31a   :  { %2591 = vmatpush3.bf16.msra.mxu0 %v2761_v43  ;;  %2613 = vmatpush3.bf16.msra.mxu1 %v2762_v44  ;;  %v2543_v43 = vld [vmem:[#allocation11] ss:$0 sm:$0xff] }
 0x31b   :  { %2592 = vmatprep.subr.bf16.mxu0 %v2763_v45  ;;  %2614 = vmatprep.subr.bf16.mxu1 %v2764_v46 }
 0x31e   :  { %2593 = vmatpush3.bf16.msra.mxu0 %v2765_v47  ;;  %2615 = vmatpush3.bf16.msra.mxu1 %v2766_v48 }
 0x31f   :  { %2594 = vmatprep.subr.bf16.mxu0 %v2767_v49  ;;  %2616 = vmatprep.subr.bf16.mxu1 %v2768_v50 }
 0x322   :  { %2595 = vmatpush3.bf16.msra.mxu0 %v2769_v51  ;;  %2617 = vmatpush3.bf16.msra.mxu1 %v2770_v52 }
 0x3d8   :  { %v1620_v3 = vpop.f32.mrb[0].mxu0  ;;  %v2050_v4 = vpop.f32.mrb[0].mxu1 }
 0x3d9   :  { %v2081_v7 = vmul.f32 %v2064_v61, %v1620_v3  ;;  %v2083_v8 = vmul.f32 %v2072_v62, %v2050_v4  ;;  %v1622_v9 = vpop.f32.mrb[1].mxu0  ;;  %v2052_v10 = vpop.f32.mrb[1].mxu1 }
 0x3da   :  { %v2082_v11 = vmul.f32 %v2068_v63, %v1622_v9  ;;  %v2084_v12 = vmul.f32 %v2076_v0, %v2052_v10  ;;  %v1624_v13 = vpop.f32.mrb[2].mxu0  ;;  %v2054_v14 = vpop.f32.mrb[2].mxu1 }
 0x3db   :  { %v2111_v15 = vadd.f32 %v2094_v1, %v2081_v7  ;;  %v2113_v16 = vadd.f32 %v2102_v2, %v2083_v8  ;;  %v2085_v17 = vmul.f32 %v2064_v61, %v1624_v13  ;;  %v2087_v18 = vmul.f32 %v2072_v62, %v2054_v14  ;;  %v1626_v19 = vpop.f32.mrb[3].mxu0  ;;  %v2056_v20 = vpop.f32.mrb[3].mxu1 }
 0x3dc   :  { %v2112_v21 = vadd.f32 %v2098_v5, %v2082_v11  ;;  %v2114_v22 = vadd.f32 %v2106_v6, %v2084_v12  ;;  %v2086_v23 = vmul.f32 %v2068_v63, %v1626_v19  ;;  %v2088_v24 = vmul.f32 %v2076_v0, %v2056_v20  ;;  %v2577_v63 = vld [vmem:[#allocation2] ss:$0 sm:$0xff] }
 0x3dd   :  { %v2115_v25 = vadd.f32 %v2094_v1, %v2085_v17  ;;  %v2117_v26 = vadd.f32 %v2102_v2, %v2087_v18  ;;  %v2119_v29 = vmax.f32 %v2111_v15, 0.0  ;;  %v2121_v30 = vmax.f32 %v2113_v16, 0.0 }
 0x3de   :  { %v2116_v27 = vadd.f32 %v2098_v5, %v2086_v23  ;;  %v2118_v28 = vadd.f32 %v2106_v6, %v2088_v24  ;;  %v2120_v33 = vmax.f32 %v2112_v21, 0.0  ;;  %v2122_v34 = vmax.f32 %v2114_v22, 0.0 }
 0x3df   :  { %v2123_v31 = vmax.f32 %v2115_v25, 0.0  ;;  %v2125_v32 = vmax.f32 %v2117_v26, 0.0 }
 0x3e0   :  { %v2124_v35 = vmax.f32 %v2116_v27, 0.0  ;;  %v2126_v36 = vmax.f32 %v2118_v28, 0.0 }
 0x3e1   :  { %v2127_v37 = vpack.c.bf16 %v2123_v31, %v2119_v29  ;;  %v2129_v38 = vpack.c.bf16 %v2125_v32, %v2121_v30 }
 0x3e2   :  { %v2128_v39 = vpack.c.bf16 %v2124_v35, %v2120_v33  ;;  %v2130_v40 = vpack.c.bf16 %v2126_v36, %v2122_v34 }
 0x3e4   :  { %2426 = vmatprep.mubr.bf16.mxu0 %v2128_v39  ;;  %2467 = vmatprep.mubr.bf16.mxu1 %v2130_v40 }
 0x3e5   :  { %2427 = vmatmul.mubr.bf16.vlgmr.msra.gmra.mrb[4].mxu0 %v2127_v37  ;;  %2468 = vmatmul.mubr.bf16.vlgmr.msra.gmra.mrb[4].mxu1 %v2129_v38 }
 0x4b8   :  { %v2596_v41 = vpop.f32.mrb[4].mxu0  ;;  %v2618_v42 = vpop.f32.mrb[4].mxu1 }
 0x4b9   :  { %v2597_v44 = vpop.f32.mrb[5].mxu0  ;;  %v2619_v45 = vpop.f32.mrb[5].mxu1 }
 0x4ba   :  { %v2598_v46 = vadd.f32 %v2597_v44, %v2596_v41  ;;  %v2620_v47 = vadd.f32 %v2619_v45, %v2618_v42  ;;  %v2599_v48 = vpop.f32.mrb[6].mxu0  ;;  %v2621_v49 = vpop.f32.mrb[6].mxu1 }
 0x4bb   :  { %v2600_v50 = vpop.f32.mrb[7].mxu0  ;;  %v2622_v51 = vpop.f32.mrb[7].mxu1 }
 0x4bc   :  { %v2429_v52 = vadd.f32 %v2598_v46, %v2543_v43  ;;  %v2601_v53 = vadd.f32 %v2600_v50, %v2599_v48  ;;  %v2623_v54 = vadd.f32 %v2622_v51, %v2621_v49 }
 0x4be   :  { %v2432_v55 = vadd.f32 %v2601_v53, %v2543_v43  ;;  %v2470_v56 = vadd.f32 %v2620_v47, %v2429_v52 }
 0x4c0   :  { %v2473_v58 = vadd.f32 %v2623_v54, %v2432_v55  ;;  %v2476_v59 = vmax.f32 %v2470_v56, 0.0 }
 0x4c2   :  { %v2477_v60 = vmax.f32 %v2473_v58, 0.0  ;;  %v2485_v61 = vmul.f32 %v2576_v57, %v2476_v59 }
 0x4c4   :  { %2487 = vadd.xlane.f32.xlu0 %v2485_v61  ;;  %v2486_v62 = vmul.f32 %v2576_v57, %v2477_v60 }
 0x4c8   :  { %2489 = vadd.xlane.f32.xlu0 %v2486_v62 }
 0x551   :  { %v2488_v0 = vpop.xlane.xlu0 %2487 }
 0x552   :  { %v2498_v1 = vadd.f32 %v2577_v63, %v2488_v0 }
 0x554   :  { %v2578_v2 = vmul.f32 -1.442695, %v2498_v1 }
 0x555   :  { %v2490_v3 = vpop.xlane.xlu0 %2489 }
 0x556   :  { %2771 = vpow2.f32 %v2578_v2  ;;  %v2499_v4 = vadd.f32 %v2577_v63, %v2490_v3 }
 0x558   :  { %v2579_v5 = vmul.f32 -1.442695, %v2499_v4 }
 0x55a   :  { %2773 = vpow2.f32 %v2579_v5 }
 0x560   :  { %v2772_v6 = vpop.eup %2771 }
 0x561   :  { %v2506_v7 = vadd.f32 1.0, %v2772_v6 }
 0x563   :  { %2775 = vrcp.f32 %v2506_v7 }
 0x564   :  { %v2774_v8 = vpop.eup %2773 }
 0x565   :  { %v2507_v9 = vadd.f32 1.0, %v2774_v8 }
 0x567   :  { %2777 = vrcp.f32 %v2507_v9 }
 0x56d   :  { %v2776_v10 = vpop.eup %2775 }
 0x56e   :  { %2513 = vst.msk [vmem:[%s3107_s8] sm:$0xff] %vm2512_vm0, %v2776_v10 }
 0x571   :  { %v2778_v11 = vpop.eup %2777 }
 0x572   :  { %2514 = vst.msk [vmem:[%s3107_s8 + $0x8] sm:$0xff] %vm2512_vm0, %v2778_v11 }
 0x573   :  { %2519 = vsyncpa [#allocation4], 1 }
 0x574   :  { %2520 = vsyncpa [#allocation6], 1 }
 0x575   :  { %2521 = vsyncpa [#allocation9], 1 }
 0x576   :  { %2522 = vsyncpa [#allocation12], 1 }

</bundles_post_ra>
